<compile_context>
chip_gen: v7x
topology: tpu7x:2x2x1
jax: 0.10.0
libtpu: 0.0.40
codegen_flags: <defaults>
</compile_context>

<pallas_src>
import jax
import jax.numpy as jnp
from jax.experimental import pallas as pl
from jax.experimental.pallas import tpu as pltpu


# ----------------------------------------------------------------------------
# Pallas kernel: fused  (patches_bf16 @ W_bf16) + shift  ->  LeakyReLU(0.1)
# ----------------------------------------------------------------------------
def _fused_matmul_shift_lrelu_kernel(p_ref, w_ref, shift_ref, o_ref):
    # p_ref:     (TM, K)     bf16 im2col patch tile
    # w_ref:     (K, Cout)   bf16 conv weight (BN scale pre-folded)
    # shift_ref: (1, Cout)   f32 folded bias/BN shift
    # o_ref:     (TM, Cout)  f32 output tile
    acc = jnp.dot(p_ref[...], w_ref[...], preferred_element_type=jnp.float32)
    y = acc + shift_ref[...]
    o_ref[...] = jnp.maximum(y, 0.1 * y).astype(o_ref.dtype)


def _round_up(x, m):
    return (x + m - 1) // m * m


_TM_MAX = 512  # 256-aligned (v6e MXU), 128-aligned (v5e), small vs v7x VMEM.


def _fused_conv_layer(x_nhwc, w_oihw, scale, shift, *, stride=2, pad=1):
    """One Conv2d(4,2,1) + folded bias/BN + LeakyReLU(0.1); NHWC in/out."""
    N, H, W, Cin = x_nhwc.shape
    Cout, Cin_w, KH, KW = w_oihw.shape
    assert Cin == Cin_w
    Ho = (H + 2 * pad - KH) // stride + 1
    Wo = (W + 2 * pad - KW) // stride + 1

    # ---- glue: im2col patch extraction in bf16 (static slicing) ------------
    x_bf16 = x_nhwc.astype(jnp.bfloat16)
    xp = jnp.pad(x_bf16, ((0, 0), (pad, pad), (pad, pad), (0, 0)))
    cols = []
    for kh in range(KH):
        for kw in range(KW):
            cols.append(
                xp[:, kh:kh + stride * Ho:stride, kw:kw + stride * Wo:stride, :]
            )
    # K-dim ordering: (kh, kw, Cin)
    patches = jnp.concatenate(cols, axis=-1).reshape(N * Ho * Wo, KH * KW * Cin)

    # ---- weight prep: (Cout,Cin,KH,KW) -> (K,Cout), fold BN scale, bf16 ----
    w_mat = jnp.transpose(w_oihw, (2, 3, 1, 0)).reshape(KH * KW * Cin, Cout)
    w_mat = (w_mat * scale[None, :]).astype(jnp.bfloat16)
    shift2 = shift.reshape(1, Cout).astype(jnp.float32)

    M, K = patches.shape

    # ---- M tiling (pad rows up so TM divides M evenly) ----------------------
    m_pad = _round_up(M, 8)
    if m_pad > _TM_MAX:
        tm = _TM_MAX
        m_pad = _round_up(M, tm)
    else:
        tm = m_pad
    if m_pad != M:
        patches = jnp.pad(patches, ((0, m_pad - M), (0, 0)))
    grid_m = m_pad // tm

    cost = pl.CostEstimate(
        flops=2 * m_pad * K * Cout,
        transcendentals=0,
        bytes_accessed=m_pad * K * 2 + K * Cout * 2 + Cout * 4 + m_pad * Cout * 4,
    )

    out = pl.pallas_call(
        _fused_matmul_shift_lrelu_kernel,
        out_shape=jax.ShapeDtypeStruct((m_pad, Cout), jnp.float32),
        grid=(grid_m,),
        in_specs=[
            pl.BlockSpec((tm, K), lambda i: (i, 0)),      # patches tile (pipelined)
            pl.BlockSpec((K, Cout), lambda i: (0, 0)),    # full weight, resident
            pl.BlockSpec((1, Cout), lambda i: (0, 0)),    # shift, resident
        ],
        out_specs=pl.BlockSpec((tm, Cout), lambda i: (i, 0)),
        compiler_params=pltpu.CompilerParams(
            dimension_semantics=("parallel",),            # dual-TC shard on v7x
            vmem_limit_bytes=32 * 1024 * 1024,
        ),
        cost_estimate=cost,
    )(patches, w_mat, shift2)

    if m_pad != M:
        out = out[:M]
    return out.reshape(N, Ho, Wo, Cout)


# ----------------------------------------------------------------------------
# Parameter construction (deterministic, synthetic)
# ----------------------------------------------------------------------------
_EPS = 1e-5


def _make_params(key):
    """Build conv weights / biases / BN stats for the 5 layers."""
    specs = [
        # (Cin, Cout, has_bias, has_bn)
        (3, 16, True, False),
        (16, 32, True, True),
        (32, 64, True, True),
        (64, 128, False, True),
        (128, 256, False, True),
    ]
    params = []
    for (cin, cout, has_bias, has_bn) in specs:
        key, kw, kb, kg, kbeta, km, kv = jax.random.split(key, 7)
        w = 0.05 * jax.random.normal(kw, (cout, cin, 4, 4), jnp.float32)
        bias = (0.01 * jax.random.normal(kb, (cout,), jnp.float32)
                if has_bias else jnp.zeros((cout,), jnp.float32))
        if has_bn:
            gamma = 1.0 + 0.1 * jax.random.normal(kg, (cout,), jnp.float32)
            beta = 0.01 * jax.random.normal(kbeta, (cout,), jnp.float32)
            mean = 0.01 * jax.random.normal(km, (cout,), jnp.float32)
            var = 1.0 + 0.1 * jax.random.uniform(kv, (cout,), jnp.float32)
            scale = gamma / jnp.sqrt(var + _EPS)
            shift = beta + (bias - mean) * scale
        else:
            scale = jnp.ones((cout,), jnp.float32)
            shift = bias
        params.append((w, scale, shift))
    return params


# ----------------------------------------------------------------------------
# Full forward
# ----------------------------------------------------------------------------
@jax.jit
def discriminator_forward(x_nchw, params):
    """x_nchw: (N, 3, H, W) float32  ->  (N, 256, H/32, W/32) float32."""
    x = jnp.transpose(x_nchw, (0, 2, 3, 1))  # NCHW -> NHWC
    for (w, scale, shift) in params:
        x = _fused_conv_layer(x, w, scale, shift)
    return jnp.transpose(x, (0, 3, 1, 2))  # NHWC -> NCHW


if __name__ == "__main__":
    key = jax.random.PRNGKey(0)
    key, kx = jax.random.split(key)

    # Small but valid shape: spatial 32 survives 5 stride-2 convs -> 1x1.
    x = jax.random.normal(kx, (2, 3, 32, 32), jnp.float32)
    params = _make_params(key)

    out = discriminator_forward(x, params)
    out = jax.block_until_ready(out)

    assert out.shape == (2, 256, 1, 1), out.shape
    assert out.dtype == jnp.float32
    assert bool(jnp.all(jnp.isfinite(out)))
    print("KERNEL_OK")
</pallas_src>

<mosaic_0001>
module attributes {stable_mosaic.version = 11 : i64} {
  func.func @_fused_matmul_shift_lrelu_kernel(%arg0: i32, %arg1: memref<512x48xbf16, #tpu.memory_space<vmem>>, %arg2: memref<48x16xbf16, #tpu.memory_space<vmem>>, %arg3: memref<1x16xf32, #tpu.memory_space<vmem>>, %arg4: memref<512x16xf32, #tpu.memory_space<vmem>>) attributes {dimension_semantics = [#tpu.dimension_semantics<parallel>], iteration_bounds = array<i64: 1>, scalar_prefetch = 0 : i64, scratch_operands = 0 : i64, tpu.core_type = #tpu.core_type<tc>, window_params = [{transform_indices = @transform_0, window_bounds = array<i64: 512, 48>}, {pipeline_mode = #tpu.pipeline_mode<synchronous>, transform_indices = @transform_1, window_bounds = array<i64: 48, 16>}, {pipeline_mode = #tpu.pipeline_mode<synchronous>, transform_indices = @transform_2, window_bounds = array<i64: 1, 16>}, {transform_indices = @transform_3, window_bounds = array<i64: 512, 16>}]} {
    %c0 = arith.constant 0 : index
    %c0_0 = arith.constant 0 : index
    %0 = vector.load %arg1[%c0, %c0_0] : memref<512x48xbf16, #tpu.memory_space<vmem>>, vector<512x48xbf16>
    %c0_1 = arith.constant 0 : index
    %c0_2 = arith.constant 0 : index
    %1 = vector.load %arg2[%c0_1, %c0_2] : memref<48x16xbf16, #tpu.memory_space<vmem>>, vector<48x16xbf16>
    %cst = arith.constant dense<0.000000e+00> : vector<512x16xf32>
    %2 = tpu.matmul %0, %1, %cst {dimension_numbers = #tpu.dot_dimension_numbers<[1], [0], [0], [1], [0, 0, 1, 1], [], []>} : vector<512x48xbf16>, vector<48x16xbf16>, vector<512x16xf32> -> vector<512x16xf32>
    %c0_3 = arith.constant 0 : index
    %c0_4 = arith.constant 0 : index
    %3 = vector.load %arg3[%c0_3, %c0_4] : memref<1x16xf32, #tpu.memory_space<vmem>>, vector<1x16xf32>
    %4 = vector.broadcast %3 : vector<1x16xf32> to vector<512x16xf32>
    %5 = arith.addf %2, %4 : vector<512x16xf32>
    %cst_5 = arith.constant 1.000000e-01 : f32
    %6 = vector.broadcast %cst_5 : f32 to vector<512x16xf32>
    %7 = arith.mulf %6, %5 : vector<512x16xf32>
    %8 = arith.maximumf %5, %7 : vector<512x16xf32>
    %c0_6 = arith.constant 0 : index
    %c0_7 = arith.constant 0 : index
    %9 = vector.load %arg4[%c0_6, %c0_7] : memref<512x16xf32, #tpu.memory_space<vmem>>, vector<512x16xf32>
    tpu.vector_store %arg4[%c0_6, %c0_7], %8 {strides = array<i32>} : memref<512x16xf32, #tpu.memory_space<vmem>>, vector<512x16xf32>,
    return
  }
  func.func @transform_0(%arg0: i32) -> (i32, i32) {
    %c0_i32 = arith.constant 0 : i32
    %c0_i32_0 = arith.constant 0 : i32
    return %arg0, %c0_i32 : i32, i32
  }
  func.func @transform_1(%arg0: i32) -> (i32, i32) {
    %c0_i32 = arith.constant 0 : i32
    %c0_i32_0 = arith.constant 0 : i32
    %c0_i32_1 = arith.constant 0 : i32
    return %c0_i32, %c0_i32_0 : i32, i32
  }
  func.func @transform_2(%arg0: i32) -> (i32, i32) {
    %c0_i32 = arith.constant 0 : i32
    %c0_i32_0 = arith.constant 0 : i32
    %c0_i32_1 = arith.constant 0 : i32
    return %c0_i32, %c0_i32_0 : i32, i32
  }
  func.func @transform_3(%arg0: i32) -> (i32, i32) {
    %c0_i32 = arith.constant 0 : i32
    %c0_i32_0 = arith.constant 0 : i32
    return %arg0, %c0_i32 : i32, i32
  }
}

module attributes {stable_mosaic.version = 11 : i64} {
  func.func @_fused_matmul_shift_lrelu_kernel(%arg0: i32, %arg1: memref<128x256xbf16, #tpu.memory_space<vmem>>, %arg2: memref<256x32xbf16, #tpu.memory_space<vmem>>, %arg3: memref<1x32xf32, #tpu.memory_space<vmem>>, %arg4: memref<128x32xf32, #tpu.memory_space<vmem>>) attributes {dimension_semantics = [#tpu.dimension_semantics<parallel>], iteration_bounds = array<i64: 1>, scalar_prefetch = 0 : i64, scratch_operands = 0 : i64, tpu.core_type = #tpu.core_type<tc>, window_params = [{transform_indices = @transform_0, window_bounds = array<i64: 128, 256>}, {pipeline_mode = #tpu.pipeline_mode<synchronous>, transform_indices = @transform_1, window_bounds = array<i64: 256, 32>}, {pipeline_mode = #tpu.pipeline_mode<synchronous>, transform_indices = @transform_2, window_bounds = array<i64: 1, 32>}, {transform_indices = @transform_3, window_bounds = array<i64: 128, 32>}]} {
    %c0 = arith.constant 0 : index
    %c0_0 = arith.constant 0 : index
    %0 = vector.load %arg1[%c0, %c0_0] : memref<128x256xbf16, #tpu.memory_space<vmem>>, vector<128x256xbf16>
    %c0_1 = arith.constant 0 : index
    %c0_2 = arith.constant 0 : index
    %1 = vector.load %arg2[%c0_1, %c0_2] : memref<256x32xbf16, #tpu.memory_space<vmem>>, vector<256x32xbf16>
    %cst = arith.constant dense<0.000000e+00> : vector<128x32xf32>
    %2 = tpu.matmul %0, %1, %cst {dimension_numbers = #tpu.dot_dimension_numbers<[1], [0], [0], [1], [0, 0, 1, 1], [], []>} : vector<128x256xbf16>, vector<256x32xbf16>, vector<128x32xf32> -> vector<128x32xf32>
    %c0_3 = arith.constant 0 : index
    %c0_4 = arith.constant 0 : index
    %3 = vector.load %arg3[%c0_3, %c0_4] : memref<1x32xf32, #tpu.memory_space<vmem>>, vector<1x32xf32>
    %4 = vector.broadcast %3 : vector<1x32xf32> to vector<128x32xf32>
    %5 = arith.addf %2, %4 : vector<128x32xf32>
    %cst_5 = arith.constant 1.000000e-01 : f32
    %6 = vector.broadcast %cst_5 : f32 to vector<128x32xf32>
    %7 = arith.mulf %6, %5 : vector<128x32xf32>
    %8 = arith.maximumf %5, %7 : vector<128x32xf32>
    %c0_6 = arith.constant 0 : index
    %c0_7 = arith.constant 0 : index
    %9 = vector.load %arg4[%c0_6, %c0_7] : memref<128x32xf32, #tpu.memory_space<vmem>>, vector<128x32xf32>
    tpu.vector_store %arg4[%c0_6, %c0_7], %8 {strides = array<i32>} : memref<128x32xf32, #tpu.memory_space<vmem>>, vector<128x32xf32>,
    return
  }
  func.func @transform_0(%arg0: i32) -> (i32, i32) {
    %c0_i32 = arith.constant 0 : i32
    %c0_i32_0 = arith.constant 0 : i32
    return %arg0, %c0_i32 : i32, i32
  }
  func.func @transform_1(%arg0: i32) -> (i32, i32) {
    %c0_i32 = arith.constant 0 : i32
    %c0_i32_0 = arith.constant 0 : i32
    %c0_i32_1 = arith.constant 0 : i32
    return %c0_i32, %c0_i32_0 : i32, i32
  }
  func.func @transform_2(%arg0: i32) -> (i32, i32) {
    %c0_i32 = arith.constant 0 : i32
    %c0_i32_0 = arith.constant 0 : i32
    %c0_i32_1 = arith.constant 0 : i32
    return %c0_i32, %c0_i32_0 : i32, i32
  }
  func.func @transform_3(%arg0: i32) -> (i32, i32) {
    %c0_i32 = arith.constant 0 : i32
    %c0_i32_0 = arith.constant 0 : i32
    return %arg0, %c0_i32 : i32, i32
  }
}

module attributes {stable_mosaic.version = 11 : i64} {
  func.func @_fused_matmul_shift_lrelu_kernel(%arg0: i32, %arg1: memref<32x512xbf16, #tpu.memory_space<vmem>>, %arg2: memref<512x64xbf16, #tpu.memory_space<vmem>>, %arg3: memref<1x64xf32, #tpu.memory_space<vmem>>, %arg4: memref<32x64xf32, #tpu.memory_space<vmem>>) attributes {dimension_semantics = [#tpu.dimension_semantics<parallel>], iteration_bounds = array<i64: 1>, scalar_prefetch = 0 : i64, scratch_operands = 0 : i64, tpu.core_type = #tpu.core_type<tc>, window_params = [{transform_indices = @transform_0, window_bounds = array<i64: 32, 512>}, {pipeline_mode = #tpu.pipeline_mode<synchronous>, transform_indices = @transform_1, window_bounds = array<i64: 512, 64>}, {pipeline_mode = #tpu.pipeline_mode<synchronous>, transform_indices = @transform_2, window_bounds = array<i64: 1, 64>}, {transform_indices = @transform_3, window_bounds = array<i64: 32, 64>}]} {
    %c0 = arith.constant 0 : index
    %c0_0 = arith.constant 0 : index
    %0 = vector.load %arg1[%c0, %c0_0] : memref<32x512xbf16, #tpu.memory_space<vmem>>, vector<32x512xbf16>
    %c0_1 = arith.constant 0 : index
    %c0_2 = arith.constant 0 : index
    %1 = vector.load %arg2[%c0_1, %c0_2] : memref<512x64xbf16, #tpu.memory_space<vmem>>, vector<512x64xbf16>
    %cst = arith.constant dense<0.000000e+00> : vector<32x64xf32>
    %2 = tpu.matmul %0, %1, %cst {dimension_numbers = #tpu.dot_dimension_numbers<[1], [0], [0], [1], [0, 0, 1, 1], [], []>} : vector<32x512xbf16>, vector<512x64xbf16>, vector<32x64xf32> -> vector<32x64xf32>
    %c0_3 = arith.constant 0 : index
    %c0_4 = arith.constant 0 : index
    %3 = vector.load %arg3[%c0_3, %c0_4] : memref<1x64xf32, #tpu.memory_space<vmem>>, vector<1x64xf32>
    %4 = vector.broadcast %3 : vector<1x64xf32> to vector<32x64xf32>
    %5 = arith.addf %2, %4 : vector<32x64xf32>
    %cst_5 = arith.constant 1.000000e-01 : f32
    %6 = vector.broadcast %cst_5 : f32 to vector<32x64xf32>
    %7 = arith.mulf %6, %5 : vector<32x64xf32>
    %8 = arith.maximumf %5, %7 : vector<32x64xf32>
    %c0_6 = arith.constant 0 : index
    %c0_7 = arith.constant 0 : index
    %9 = vector.load %arg4[%c0_6, %c0_7] : memref<32x64xf32, #tpu.memory_space<vmem>>, vector<32x64xf32>
    tpu.vector_store %arg4[%c0_6, %c0_7], %8 {strides = array<i32>} : memref<32x64xf32, #tpu.memory_space<vmem>>, vector<32x64xf32>,
    return
  }
  func.func @transform_0(%arg0: i32) -> (i32, i32) {
    %c0_i32 = arith.constant 0 : i32
    %c0_i32_0 = arith.constant 0 : i32
    return %arg0, %c0_i32 : i32, i32
  }
  func.func @transform_1(%arg0: i32) -> (i32, i32) {
    %c0_i32 = arith.constant 0 : i32
    %c0_i32_0 = arith.constant 0 : i32
    %c0_i32_1 = arith.constant 0 : i32
    return %c0_i32, %c0_i32_0 : i32, i32
  }
  func.func @transform_2(%arg0: i32) -> (i32, i32) {
    %c0_i32 = arith.constant 0 : i32
    %c0_i32_0 = arith.constant 0 : i32
    %c0_i32_1 = arith.constant 0 : i32
    return %c0_i32, %c0_i32_0 : i32, i32
  }
  func.func @transform_3(%arg0: i32) -> (i32, i32) {
    %c0_i32 = arith.constant 0 : i32
    %c0_i32_0 = arith.constant 0 : i32
    return %arg0, %c0_i32 : i32, i32
  }
}

module attributes {stable_mosaic.version = 11 : i64} {
  func.func @_fused_matmul_shift_lrelu_kernel(%arg0: i32, %arg1: memref<8x1024xbf16, #tpu.memory_space<vmem>>, %arg2: memref<1024x128xbf16, #tpu.memory_space<vmem>>, %arg3: memref<1x128xf32, #tpu.memory_space<vmem>>, %arg4: memref<8x128xf32, #tpu.memory_space<vmem>>) attributes {dimension_semantics = [#tpu.dimension_semantics<parallel>], iteration_bounds = array<i64: 1>, scalar_prefetch = 0 : i64, scratch_operands = 0 : i64, tpu.core_type = #tpu.core_type<tc>, window_params = [{transform_indices = @transform_0, window_bounds = array<i64: 8, 1024>}, {pipeline_mode = #tpu.pipeline_mode<synchronous>, transform_indices = @transform_1, window_bounds = array<i64: 1024, 128>}, {pipeline_mode = #tpu.pipeline_mode<synchronous>, transform_indices = @transform_2, window_bounds = array<i64: 1, 128>}, {transform_indices = @transform_3, window_bounds = array<i64: 8, 128>}]} {
    %c0 = arith.constant 0 : index
    %c0_0 = arith.constant 0 : index
    %0 = vector.load %arg1[%c0, %c0_0] : memref<8x1024xbf16, #tpu.memory_space<vmem>>, vector<8x1024xbf16>
    %c0_1 = arith.constant 0 : index
    %c0_2 = arith.constant 0 : index
    %1 = vector.load %arg2[%c0_1, %c0_2] : memref<1024x128xbf16, #tpu.memory_space<vmem>>, vector<1024x128xbf16>
    %cst = arith.constant dense<0.000000e+00> : vector<8x128xf32>
    %2 = tpu.matmul %0, %1, %cst {dimension_numbers = #tpu.dot_dimension_numbers<[1], [0], [0], [1], [0, 0, 1, 1], [], []>} : vector<8x1024xbf16>, vector<1024x128xbf16>, vector<8x128xf32> -> vector<8x128xf32>
    %c0_3 = arith.constant 0 : index
    %c0_4 = arith.constant 0 : index
    %3 = vector.load %arg3[%c0_3, %c0_4] : memref<1x128xf32, #tpu.memory_space<vmem>>, vector<1x128xf32>
    %4 = vector.broadcast %3 : vector<1x128xf32> to vector<8x128xf32>
    %5 = arith.addf %2, %4 : vector<8x128xf32>
    %cst_5 = arith.constant 1.000000e-01 : f32
    %6 = vector.broadcast %cst_5 : f32 to vector<8x128xf32>
    %7 = arith.mulf %6, %5 : vector<8x128xf32>
    %8 = arith.maximumf %5, %7 : vector<8x128xf32>
    %c0_6 = arith.constant 0 : index
    %c0_7 = arith.constant 0 : index
    %9 = vector.load %arg4[%c0_6, %c0_7] : memref<8x128xf32, #tpu.memory_space<vmem>>, vector<8x128xf32>
    tpu.vector_store %arg4[%c0_6, %c0_7], %8 {strides = array<i32>} : memref<8x128xf32, #tpu.memory_space<vmem>>, vector<8x128xf32>,
    return
  }
  func.func @transform_0(%arg0: i32) -> (i32, i32) {
    %c0_i32 = arith.constant 0 : i32
    %c0_i32_0 = arith.constant 0 : i32
    return %arg0, %c0_i32 : i32, i32
  }
  func.func @transform_1(%arg0: i32) -> (i32, i32) {
    %c0_i32 = arith.constant 0 : i32
    %c0_i32_0 = arith.constant 0 : i32
    %c0_i32_1 = arith.constant 0 : i32
    return %c0_i32, %c0_i32_0 : i32, i32
  }
  func.func @transform_2(%arg0: i32) -> (i32, i32) {
    %c0_i32 = arith.constant 0 : i32
    %c0_i32_0 = arith.constant 0 : i32
    %c0_i32_1 = arith.constant 0 : i32
    return %c0_i32, %c0_i32_0 : i32, i32
  }
  func.func @transform_3(%arg0: i32) -> (i32, i32) {
    %c0_i32 = arith.constant 0 : i32
    %c0_i32_0 = arith.constant 0 : i32
    return %arg0, %c0_i32 : i32, i32
  }
}

module attributes {stable_mosaic.version = 11 : i64} {
  func.func @_fused_matmul_shift_lrelu_kernel(%arg0: i32, %arg1: memref<8x2048xbf16, #tpu.memory_space<vmem>>, %arg2: memref<2048x256xbf16, #tpu.memory_space<vmem>>, %arg3: memref<1x256xf32, #tpu.memory_space<vmem>>, %arg4: memref<8x256xf32, #tpu.memory_space<vmem>>) attributes {dimension_semantics = [#tpu.dimension_semantics<parallel>], iteration_bounds = array<i64: 1>, scalar_prefetch = 0 : i64, scratch_operands = 0 : i64, tpu.core_type = #tpu.core_type<tc>, window_params = [{transform_indices = @transform_0, window_bounds = array<i64: 8, 2048>}, {pipeline_mode = #tpu.pipeline_mode<synchronous>, transform_indices = @transform_1, window_bounds = array<i64: 2048, 256>}, {pipeline_mode = #tpu.pipeline_mode<synchronous>, transform_indices = @transform_2, window_bounds = array<i64: 1, 256>}, {transform_indices = @transform_3, window_bounds = array<i64: 8, 256>}]} {
    %c0 = arith.constant 0 : index
    %c0_0 = arith.constant 0 : index
    %0 = vector.load %arg1[%c0, %c0_0] : memref<8x2048xbf16, #tpu.memory_space<vmem>>, vector<8x2048xbf16>
    %c0_1 = arith.constant 0 : index
    %c0_2 = arith.constant 0 : index
    %1 = vector.load %arg2[%c0_1, %c0_2] : memref<2048x256xbf16, #tpu.memory_space<vmem>>, vector<2048x256xbf16>
    %cst = arith.constant dense<0.000000e+00> : vector<8x256xf32>
    %2 = tpu.matmul %0, %1, %cst {dimension_numbers = #tpu.dot_dimension_numbers<[1], [0], [0], [1], [0, 0, 1, 1], [], []>} : vector<8x2048xbf16>, vector<2048x256xbf16>, vector<8x256xf32> -> vector<8x256xf32>
    %c0_3 = arith.constant 0 : index
    %c0_4 = arith.constant 0 : index
    %3 = vector.load %arg3[%c0_3, %c0_4] : memref<1x256xf32, #tpu.memory_space<vmem>>, vector<1x256xf32>
    %4 = vector.broadcast %3 : vector<1x256xf32> to vector<8x256xf32>
    %5 = arith.addf %2, %4 : vector<8x256xf32>
    %cst_5 = arith.constant 1.000000e-01 : f32
    %6 = vector.broadcast %cst_5 : f32 to vector<8x256xf32>
    %7 = arith.mulf %6, %5 : vector<8x256xf32>
    %8 = arith.maximumf %5, %7 : vector<8x256xf32>
    %c0_6 = arith.constant 0 : index
    %c0_7 = arith.constant 0 : index
    %9 = vector.load %arg4[%c0_6, %c0_7] : memref<8x256xf32, #tpu.memory_space<vmem>>, vector<8x256xf32>
    tpu.vector_store %arg4[%c0_6, %c0_7], %8 {strides = array<i32>} : memref<8x256xf32, #tpu.memory_space<vmem>>, vector<8x256xf32>,
    return
  }
  func.func @transform_0(%arg0: i32) -> (i32, i32) {
    %c0_i32 = arith.constant 0 : i32
    %c0_i32_0 = arith.constant 0 : i32
    return %arg0, %c0_i32 : i32, i32
  }
  func.func @transform_1(%arg0: i32) -> (i32, i32) {
    %c0_i32 = arith.constant 0 : i32
    %c0_i32_0 = arith.constant 0 : i32
    %c0_i32_1 = arith.constant 0 : i32
    return %c0_i32, %c0_i32_0 : i32, i32
  }
  func.func @transform_2(%arg0: i32) -> (i32, i32) {
    %c0_i32 = arith.constant 0 : i32
    %c0_i32_0 = arith.constant 0 : i32
    %c0_i32_1 = arith.constant 0 : i32
    return %c0_i32, %c0_i32_0 : i32, i32
  }
  func.func @transform_3(%arg0: i32) -> (i32, i32) {
    %c0_i32 = arith.constant 0 : i32
    %c0_i32_0 = arith.constant 0 : i32
    return %arg0, %c0_i32 : i32, i32
  }
}

</mosaic_0001>

<bundles_post_ra>
// kernel: discriminator_forward.5
= control target key start
LH: loop header
LB: loop body
LE: loop exit
PB: predicated region body
PF: predicated region fallthrough
CT: control target
= control target key end

     0   :  { %vm270_vm0 = vcmask 392192   ;;  %vm784_vm1 = vcmask 130048   ;;  %s1549_s1 = inlined_call_operand.vmem [shape: bf16[48,16], index: 1, kind: input, shape index: {}]   ;;  %s1550_s0 = inlined_call_operand.vmem [shape: bf16[512,48], index: 0, kind: input, shape index: {}]   ;;  %s1551_s2 = inlined_call_operand.vmem [shape: f32[1,16], index: 2, kind: input, shape index: {}]   ;;  %s1552_s3 = inlined_call_operand.vmem [shape: f32[512,16], index: 3, kind: output, shape index: {}]  }
   0x1   :  { %v1032_v0 = vld [vmem:[%s1549_s1] sm:$0xff]   ;;  %v1033_v1 = vld [vmem:[%s1549_s1 + $0x8] sm:$0xff]   ;;  %v1034_v2 = vld [vmem:[%s1549_s1 + $0x10] sm:$0xff]  }
   0x2   :  { %956 = vmatprep.subr.bf16.mxu0 %v1032_v0  ;;  %1026 = vmatprep.subr.bf16.mxu1 %v1032_v0  ;;  %v1035_v3 = vld [vmem:[%s1550_s0] sm:$0xff]   ;;  %v1037_v5 = vld [vmem:[%s1550_s0 + $0x8] sm:$0xff]   ;;  %v1039_v7 = vld [vmem:[%s1550_s0 + $0x10] sm:$0xff]  }
   0x3   :  { %957 = vmatpush3.bf16.msra.mxu0 %v1032_v0  ;;  %1029 = vmatpush3.bf16.msra.mxu1 %v1032_v0  ;;  %v1036_v4 = vld [vmem:[%s1550_s0 + $0x80] sm:$0xff]   ;;  %v1038_v6 = vld [vmem:[%s1550_s0 + $0x88] sm:$0xff]   ;;  %v1040_v8 = vld [vmem:[%s1550_s0 + $0x90] sm:$0xff]  }
   0x4   :  { %958 = vmatprep.subr.bf16.mxu0 %v1033_v1  ;;  %1027 = vmatprep.subr.bf16.mxu1 %v1033_v1  ;;  %v1041_v9 = vld [vmem:[%s1550_s0 + $0x18] sm:$0xff]   ;;  %v1043_v11 = vld [vmem:[%s1550_s0 + $0x20] sm:$0xff]   ;;  %v1045_v13 = vld [vmem:[%s1550_s0 + $0x28] sm:$0xff]  }
   0x5   :  { %962 = vmatprep.mubr.msk.bf16.mxu0 %vm270_vm0, %v1035_v3  ;;  %994 = vmatprep.mubr.msk.bf16.mxu1 %vm270_vm0, %v1036_v4  ;;  %v1042_v10 = vld [vmem:[%s1550_s0 + $0x98] sm:$0xff]   ;;  %v1044_v12 = vld [vmem:[%s1550_s0 + $0xa0] sm:$0xff]   ;;  %v1046_v14 = vld [vmem:[%s1550_s0 + $0xa8] sm:$0xff]  }
   0x6   :  { %v1047_v15 = vld [vmem:[%s1550_s0 + $0x30] sm:$0xff]   ;;  %v1049_v17 = vld [vmem:[%s1550_s0 + $0x38] sm:$0xff]   ;;  %v1051_v19 = vld [vmem:[%s1550_s0 + $0x40] sm:$0xff]  }
   0x7   :  { %959 = vmatpush3.bf16.msra.mxu0 %v1033_v1  ;;  %1030 = vmatpush3.bf16.msra.mxu1 %v1033_v1  ;;  %v1048_v16 = vld [vmem:[%s1550_s0 + $0xb0] sm:$0xff]   ;;  %v1050_v18 = vld [vmem:[%s1550_s0 + $0xb8] sm:$0xff]   ;;  %v1052_v20 = vld [vmem:[%s1550_s0 + $0xc0] sm:$0xff]  }
   0x8   :  { %960 = vmatprep.subr.bf16.mxu0 %v1034_v2  ;;  %1028 = vmatprep.subr.bf16.mxu1 %v1034_v2  ;;  %v1053_v21 = vld [vmem:[%s1550_s0 + $0x48] sm:$0xff]   ;;  %v1055_v23 = vld [vmem:[%s1550_s0 + $0x50] sm:$0xff]   ;;  %v1057_v25 = vld [vmem:[%s1550_s0 + $0x58] sm:$0xff]  }
   0x9   :  { %v1054_v22 = vld [vmem:[%s1550_s0 + $0xc8] sm:$0xff]   ;;  %v1056_v24 = vld [vmem:[%s1550_s0 + $0xd0] sm:$0xff]   ;;  %v1058_v26 = vld [vmem:[%s1550_s0 + $0xd8] sm:$0xff]  }
   0xa   :  { %v1059_v27 = vld [vmem:[%s1550_s0 + $0x60] sm:$0xff]   ;;  %v1061_v29 = vld [vmem:[%s1550_s0 + $0x68] sm:$0xff]   ;;  %v1063_v31 = vld [vmem:[%s1550_s0 + $0x70] sm:$0xff]  }
   0xb   :  { %961 = vmatpush3.bf16.msra.mxu0 %v1034_v2  ;;  %1031 = vmatpush3.bf16.msra.mxu1 %v1034_v2  ;;  %v1060_v28 = vld [vmem:[%s1550_s0 + $0xe0] sm:$0xff]   ;;  %v1062_v30 = vld [vmem:[%s1550_s0 + $0xe8] sm:$0xff]   ;;  %v1064_v32 = vld [vmem:[%s1550_s0 + $0xf0] sm:$0xff]  }
   0xc   :  { %v1065_v33 = vld [vmem:[%s1550_s0 + $0x78] sm:$0xff]   ;;  %v1227_v35 = vld [vmem:[%s1551_s2] ss:$0 sm:$0xff] }
   0xd   :  { %v1066_v34 = vld [vmem:[%s1550_s0 + $0xf8] sm:$0xff]  }
   0xe   :  { %963 = vmatmul.mubr.msk.bf16.vlgmr.msra.gmra.mrb[0].mxu0 %vm270_vm0, %v1037_v5  ;;  %995 = vmatmul.mubr.msk.bf16.vlgmr.msra.gmra.mrb[0].mxu1 %vm270_vm0, %v1038_v6 }
   0xf   :  { %966 = vmatprep.mubr.msk.bf16.mxu0 %vm270_vm0, %v1039_v7  ;;  %998 = vmatprep.mubr.msk.bf16.mxu1 %vm270_vm0, %v1040_v8 }
  0x16   :  { %967 = vmatmul.mubr.msk.bf16.gmra.mrb[4].mxu0 %vm270_vm0, %v1041_v9  ;;  %999 = vmatmul.mubr.msk.bf16.gmra.mrb[4].mxu1 %vm270_vm0, %v1042_v10 }
  0x17   :  { %970 = vmatprep.mubr.msk.bf16.mxu0 %vm270_vm0, %v1043_v11  ;;  %1002 = vmatprep.mubr.msk.bf16.mxu1 %vm270_vm0, %v1044_v12 }
  0x1e   :  { %971 = vmatmul.mubr.msk.bf16.gmra.mrb[8].mxu0 %vm270_vm0, %v1045_v13  ;;  %1003 = vmatmul.mubr.msk.bf16.gmra.mrb[8].mxu1 %vm270_vm0, %v1046_v14 }
  0x1f   :  { %974 = vmatprep.mubr.msk.bf16.mxu0 %vm270_vm0, %v1047_v15  ;;  %1006 = vmatprep.mubr.msk.bf16.mxu1 %vm270_vm0, %v1048_v16 }
  0x26   :  { %975 = vmatmul.mubr.msk.bf16.gmra.mrb[12].mxu0 %vm270_vm0, %v1049_v17  ;;  %1007 = vmatmul.mubr.msk.bf16.gmra.mrb[12].mxu1 %vm270_vm0, %v1050_v18 }
  0x27   :  { %978 = vmatprep.mubr.msk.bf16.mxu0 %vm270_vm0, %v1051_v19  ;;  %1010 = vmatprep.mubr.msk.bf16.mxu1 %vm270_vm0, %v1052_v20 }
  0x2e   :  { %979 = vmatmul.mubr.msk.bf16.gmra.mrb[16].mxu0 %vm270_vm0, %v1053_v21  ;;  %1011 = vmatmul.mubr.msk.bf16.gmra.mrb[16].mxu1 %vm270_vm0, %v1054_v22 }
  0x2f   :  { %982 = vmatprep.mubr.msk.bf16.mxu0 %vm270_vm0, %v1055_v23  ;;  %1014 = vmatprep.mubr.msk.bf16.mxu1 %vm270_vm0, %v1056_v24 }
  0x36   :  { %983 = vmatmul.mubr.msk.bf16.gmra.mrb[20].mxu0 %vm270_vm0, %v1057_v25  ;;  %1015 = vmatmul.mubr.msk.bf16.gmra.mrb[20].mxu1 %vm270_vm0, %v1058_v26 }
  0x37   :  { %986 = vmatprep.mubr.msk.bf16.mxu0 %vm270_vm0, %v1059_v27  ;;  %1018 = vmatprep.mubr.msk.bf16.mxu1 %vm270_vm0, %v1060_v28 }
  0x3e   :  { %987 = vmatmul.mubr.msk.bf16.gmra.mrb[24].mxu0 %vm270_vm0, %v1061_v29  ;;  %1019 = vmatmul.mubr.msk.bf16.gmra.mrb[24].mxu1 %vm270_vm0, %v1062_v30 }
  0x3f   :  { %990 = vmatprep.mubr.msk.bf16.mxu0 %vm270_vm0, %v1063_v31  ;;  %1022 = vmatprep.mubr.msk.bf16.mxu1 %vm270_vm0, %v1064_v32 }
  0x46   :  { %991 = vmatmul.mubr.msk.bf16.gmra.mrb[28].mxu0 %vm270_vm0, %v1065_v33  ;;  %1023 = vmatmul.mubr.msk.bf16.gmra.mrb[28].mxu1 %vm270_vm0, %v1066_v34 }
  0xe1   :  { %v964_v36 = vpop.f32.mrb[0].mxu0  ;;  %v996_v37 = vpop.f32.mrb[0].mxu1 }
  0xe2   :  { %v410_v38 = vadd.f32 %v964_v36, %v1227_v35  ;;  %v538_v39 = vadd.f32 %v996_v37, %v1227_v35  ;;  %v401_v40 = vpop.f32.mrb[1].mxu0  ;;  %v529_v41 = vpop.f32.mrb[1].mxu1 }
  0xe3   :  { %v402_v42 = vadd.f32 %v1227_v35, %v401_v40  ;;  %v530_v43 = vadd.f32 %v1227_v35, %v529_v41  ;;  %v965_v44 = vpop.f32.mrb[2].mxu0  ;;  %v997_v45 = vpop.f32.mrb[2].mxu1 }
  0xe4   :  { %v658_v46 = vmul.f32 0.1, %v410_v38  ;;  %v690_v47 = vmul.f32 0.1, %v538_v39  ;;  %v413_v48 = vadd.f32 %v965_v44, %v1227_v35  ;;  %v541_v49 = vadd.f32 %v997_v45, %v1227_v35  ;;  %v404_v50 = vpop.f32.mrb[3].mxu0  ;;  %v532_v51 = vpop.f32.mrb[3].mxu1 }
  0xe5   :  { %v656_v52 = vmul.f32 0.1, %v402_v42  ;;  %v688_v53 = vmul.f32 0.1, %v530_v43  ;;  %v405_v54 = vadd.f32 %v1227_v35, %v404_v50  ;;  %v533_v55 = vadd.f32 %v1227_v35, %v532_v51 }
  0xe6   :  { %v722_v56 = vmax.f32 %v410_v38, %v658_v46  ;;  %v754_v57 = vmax.f32 %v538_v39, %v690_v47  ;;  %v659_v58 = vmul.f32 0.1, %v413_v48  ;;  %v691_v59 = vmul.f32 0.1, %v541_v49 }
  0xe7   :  { %v720_v60 = vmax.f32 %v402_v42, %v656_v52  ;;  %v752_v61 = vmax.f32 %v530_v43, %v688_v53  ;;  %v657_v62 = vmul.f32 0.1, %v405_v54  ;;  %v689_v63 = vmul.f32 0.1, %v533_v55 }
  0xe8   :  { %787 = vst.msk [vmem:[%s1552_s3 + $0x10] sm:$0xff] %vm784_vm1, %v722_v56  ;;  %819 = vst.msk [vmem:[%s1552_s3 + $0x110] sm:$0xff] %vm784_vm1, %v754_v57  ;;  %v723_v0 = vmax.f32 %v413_v48, %v659_v58  ;;  %v755_v1 = vmax.f32 %v541_v49, %v691_v59 }
  0xe9   :  { %785 = vst.msk [vmem:[%s1552_s3] sm:$0xff] %vm784_vm1, %v720_v60  ;;  %817 = vst.msk [vmem:[%s1552_s3 + $0x100] sm:$0xff] %vm784_vm1, %v752_v61  ;;  %v721_v2 = vmax.f32 %v405_v54, %v657_v62  ;;  %v753_v3 = vmax.f32 %v533_v55, %v689_v63  ;;  %v968_v4 = vpop.f32.mrb[4].mxu0  ;;  %v1000_v5 = vpop.f32.mrb[4].mxu1 }
  0xea   :  { %788 = vst.msk [vmem:[%s1552_s3 + $0x18] sm:$0xff] %vm784_vm1, %v723_v0  ;;  %820 = vst.msk [vmem:[%s1552_s3 + $0x118] sm:$0xff] %vm784_vm1, %v755_v1  ;;  %v426_v6 = vadd.f32 %v968_v4, %v1227_v35  ;;  %v554_v7 = vadd.f32 %v1000_v5, %v1227_v35  ;;  %v417_v8 = vpop.f32.mrb[5].mxu0  ;;  %v545_v9 = vpop.f32.mrb[5].mxu1 }
  0xeb   :  { %786 = vst.msk [vmem:[%s1552_s3 + $0x8] sm:$0xff] %vm784_vm1, %v721_v2  ;;  %818 = vst.msk [vmem:[%s1552_s3 + $0x108] sm:$0xff] %vm784_vm1, %v753_v3  ;;  %v418_v10 = vadd.f32 %v1227_v35, %v417_v8  ;;  %v546_v11 = vadd.f32 %v1227_v35, %v545_v9  ;;  %v969_v12 = vpop.f32.mrb[6].mxu0  ;;  %v1001_v13 = vpop.f32.mrb[6].mxu1 }
  0xec   :  { %v662_v14 = vmul.f32 0.1, %v426_v6  ;;  %v694_v15 = vmul.f32 0.1, %v554_v7  ;;  %v429_v16 = vadd.f32 %v969_v12, %v1227_v35  ;;  %v557_v17 = vadd.f32 %v1001_v13, %v1227_v35  ;;  %v420_v18 = vpop.f32.mrb[7].mxu0  ;;  %v548_v19 = vpop.f32.mrb[7].mxu1 }
  0xed   :  { %v660_v20 = vmul.f32 0.1, %v418_v10  ;;  %v692_v21 = vmul.f32 0.1, %v546_v11  ;;  %v421_v22 = vadd.f32 %v1227_v35, %v420_v18  ;;  %v549_v23 = vadd.f32 %v1227_v35, %v548_v19 }
  0xee   :  { %v726_v24 = vmax.f32 %v426_v6, %v662_v14  ;;  %v758_v25 = vmax.f32 %v554_v7, %v694_v15  ;;  %v663_v26 = vmul.f32 0.1, %v429_v16  ;;  %v695_v27 = vmul.f32 0.1, %v557_v17 }
  0xef   :  { %v724_v28 = vmax.f32 %v418_v10, %v660_v20  ;;  %v756_v29 = vmax.f32 %v546_v11, %v692_v21  ;;  %v661_v30 = vmul.f32 0.1, %v421_v22  ;;  %v693_v31 = vmul.f32 0.1, %v549_v23 }
  0xf0   :  { %791 = vst.msk [vmem:[%s1552_s3 + $0x30] sm:$0xff] %vm784_vm1, %v726_v24  ;;  %823 = vst.msk [vmem:[%s1552_s3 + $0x130] sm:$0xff] %vm784_vm1, %v758_v25  ;;  %v727_v32 = vmax.f32 %v429_v16, %v663_v26  ;;  %v759_v33 = vmax.f32 %v557_v17, %v695_v27 }
  0xf1   :  { %789 = vst.msk [vmem:[%s1552_s3 + $0x20] sm:$0xff] %vm784_vm1, %v724_v28  ;;  %821 = vst.msk [vmem:[%s1552_s3 + $0x120] sm:$0xff] %vm784_vm1, %v756_v29  ;;  %v725_v34 = vmax.f32 %v421_v22, %v661_v30  ;;  %v757_v36 = vmax.f32 %v549_v23, %v693_v31  ;;  %v972_v37 = vpop.f32.mrb[8].mxu0  ;;  %v1004_v38 = vpop.f32.mrb[8].mxu1 }
  0xf2   :  { %792 = vst.msk [vmem:[%s1552_s3 + $0x38] sm:$0xff] %vm784_vm1, %v727_v32  ;;  %824 = vst.msk [vmem:[%s1552_s3 + $0x138] sm:$0xff] %vm784_vm1, %v759_v33  ;;  %v442_v39 = vadd.f32 %v972_v37, %v1227_v35  ;;  %v570_v40 = vadd.f32 %v1004_v38, %v1227_v35  ;;  %v433_v41 = vpop.f32.mrb[9].mxu0  ;;  %v561_v42 = vpop.f32.mrb[9].mxu1 }
  0xf3   :  { %790 = vst.msk [vmem:[%s1552_s3 + $0x28] sm:$0xff] %vm784_vm1, %v725_v34  ;;  %822 = vst.msk [vmem:[%s1552_s3 + $0x128] sm:$0xff] %vm784_vm1, %v757_v36  ;;  %v434_v43 = vadd.f32 %v1227_v35, %v433_v41  ;;  %v562_v44 = vadd.f32 %v1227_v35, %v561_v42  ;;  %v973_v45 = vpop.f32.mrb[10].mxu0  ;;  %v1005_v46 = vpop.f32.mrb[10].mxu1 }
  0xf4   :  { %v666_v47 = vmul.f32 0.1, %v442_v39  ;;  %v698_v48 = vmul.f32 0.1, %v570_v40  ;;  %v445_v49 = vadd.f32 %v973_v45, %v1227_v35  ;;  %v573_v50 = vadd.f32 %v1005_v46, %v1227_v35  ;;  %v436_v51 = vpop.f32.mrb[11].mxu0  ;;  %v564_v52 = vpop.f32.mrb[11].mxu1 }
  0xf5   :  { %v664_v53 = vmul.f32 0.1, %v434_v43  ;;  %v696_v54 = vmul.f32 0.1, %v562_v44  ;;  %v437_v55 = vadd.f32 %v1227_v35, %v436_v51  ;;  %v565_v56 = vadd.f32 %v1227_v35, %v564_v52 }
  0xf6   :  { %v730_v57 = vmax.f32 %v442_v39, %v666_v47  ;;  %v762_v58 = vmax.f32 %v570_v40, %v698_v48  ;;  %v667_v59 = vmul.f32 0.1, %v445_v49  ;;  %v699_v60 = vmul.f32 0.1, %v573_v50 }
  0xf7   :  { %v728_v61 = vmax.f32 %v434_v43, %v664_v53  ;;  %v760_v62 = vmax.f32 %v562_v44, %v696_v54  ;;  %v665_v63 = vmul.f32 0.1, %v437_v55  ;;  %v697_v0 = vmul.f32 0.1, %v565_v56 }
  0xf8   :  { %795 = vst.msk [vmem:[%s1552_s3 + $0x50] sm:$0xff] %vm784_vm1, %v730_v57  ;;  %827 = vst.msk [vmem:[%s1552_s3 + $0x150] sm:$0xff] %vm784_vm1, %v762_v58  ;;  %v731_v1 = vmax.f32 %v445_v49, %v667_v59  ;;  %v763_v2 = vmax.f32 %v573_v50, %v699_v60 }
  0xf9   :  { %793 = vst.msk [vmem:[%s1552_s3 + $0x40] sm:$0xff] %vm784_vm1, %v728_v61  ;;  %825 = vst.msk [vmem:[%s1552_s3 + $0x140] sm:$0xff] %vm784_vm1, %v760_v62  ;;  %v729_v3 = vmax.f32 %v437_v55, %v665_v63  ;;  %v761_v4 = vmax.f32 %v565_v56, %v697_v0  ;;  %v976_v5 = vpop.f32.mrb[12].mxu0  ;;  %v1008_v6 = vpop.f32.mrb[12].mxu1 }
  0xfa   :  { %796 = vst.msk [vmem:[%s1552_s3 + $0x58] sm:$0xff] %vm784_vm1, %v731_v1  ;;  %828 = vst.msk [vmem:[%s1552_s3 + $0x158] sm:$0xff] %vm784_vm1, %v763_v2  ;;  %v458_v7 = vadd.f32 %v976_v5, %v1227_v35  ;;  %v586_v8 = vadd.f32 %v1008_v6, %v1227_v35  ;;  %v449_v9 = vpop.f32.mrb[13].mxu0  ;;  %v577_v10 = vpop.f32.mrb[13].mxu1 }
  0xfb   :  { %794 = vst.msk [vmem:[%s1552_s3 + $0x48] sm:$0xff] %vm784_vm1, %v729_v3  ;;  %826 = vst.msk [vmem:[%s1552_s3 + $0x148] sm:$0xff] %vm784_vm1, %v761_v4  ;;  %v450_v11 = vadd.f32 %v1227_v35, %v449_v9  ;;  %v578_v12 = vadd.f32 %v1227_v35, %v577_v10  ;;  %v977_v13 = vpop.f32.mrb[14].mxu0  ;;  %v1009_v14 = vpop.f32.mrb[14].mxu1 }
  0xfc   :  { %v670_v15 = vmul.f32 0.1, %v458_v7  ;;  %v702_v16 = vmul.f32 0.1, %v586_v8  ;;  %v461_v17 = vadd.f32 %v977_v13, %v1227_v35  ;;  %v589_v18 = vadd.f32 %v1009_v14, %v1227_v35  ;;  %v452_v19 = vpop.f32.mrb[15].mxu0  ;;  %v580_v20 = vpop.f32.mrb[15].mxu1 }
  0xfd   :  { %v668_v21 = vmul.f32 0.1, %v450_v11  ;;  %v700_v22 = vmul.f32 0.1, %v578_v12  ;;  %v453_v23 = vadd.f32 %v1227_v35, %v452_v19  ;;  %v581_v24 = vadd.f32 %v1227_v35, %v580_v20 }
  0xfe   :  { %v734_v25 = vmax.f32 %v458_v7, %v670_v15  ;;  %v766_v26 = vmax.f32 %v586_v8, %v702_v16  ;;  %v671_v27 = vmul.f32 0.1, %v461_v17  ;;  %v703_v28 = vmul.f32 0.1, %v589_v18 }
  0xff   :  { %v732_v29 = vmax.f32 %v450_v11, %v668_v21  ;;  %v764_v30 = vmax.f32 %v578_v12, %v700_v22  ;;  %v669_v31 = vmul.f32 0.1, %v453_v23  ;;  %v701_v32 = vmul.f32 0.1, %v581_v24 }
 0x100   :  { %799 = vst.msk [vmem:[%s1552_s3 + $0x70] sm:$0xff] %vm784_vm1, %v734_v25  ;;  %831 = vst.msk [vmem:[%s1552_s3 + $0x170] sm:$0xff] %vm784_vm1, %v766_v26  ;;  %v735_v33 = vmax.f32 %v461_v17, %v671_v27  ;;  %v767_v34 = vmax.f32 %v589_v18, %v703_v28 }
 0x101   :  { %797 = vst.msk [vmem:[%s1552_s3 + $0x60] sm:$0xff] %vm784_vm1, %v732_v29  ;;  %829 = vst.msk [vmem:[%s1552_s3 + $0x160] sm:$0xff] %vm784_vm1, %v764_v30  ;;  %v733_v36 = vmax.f32 %v453_v23, %v669_v31  ;;  %v765_v37 = vmax.f32 %v581_v24, %v701_v32  ;;  %v980_v38 = vpop.f32.mrb[16].mxu0  ;;  %v1012_v39 = vpop.f32.mrb[16].mxu1 }
 0x102   :  { %800 = vst.msk [vmem:[%s1552_s3 + $0x78] sm:$0xff] %vm784_vm1, %v735_v33  ;;  %832 = vst.msk [vmem:[%s1552_s3 + $0x178] sm:$0xff] %vm784_vm1, %v767_v34  ;;  %v474_v40 = vadd.f32 %v980_v38, %v1227_v35  ;;  %v602_v41 = vadd.f32 %v1012_v39, %v1227_v35  ;;  %v465_v42 = vpop.f32.mrb[17].mxu0  ;;  %v593_v43 = vpop.f32.mrb[17].mxu1 }
 0x103   :  { %798 = vst.msk [vmem:[%s1552_s3 + $0x68] sm:$0xff] %vm784_vm1, %v733_v36  ;;  %830 = vst.msk [vmem:[%s1552_s3 + $0x168] sm:$0xff] %vm784_vm1, %v765_v37  ;;  %v466_v44 = vadd.f32 %v1227_v35, %v465_v42  ;;  %v594_v45 = vadd.f32 %v1227_v35, %v593_v43  ;;  %v981_v46 = vpop.f32.mrb[18].mxu0  ;;  %v1013_v47 = vpop.f32.mrb[18].mxu1 }
 0x104   :  { %v674_v48 = vmul.f32 0.1, %v474_v40  ;;  %v706_v49 = vmul.f32 0.1, %v602_v41  ;;  %v477_v50 = vadd.f32 %v981_v46, %v1227_v35  ;;  %v605_v51 = vadd.f32 %v1013_v47, %v1227_v35  ;;  %v468_v52 = vpop.f32.mrb[19].mxu0  ;;  %v596_v53 = vpop.f32.mrb[19].mxu1 }
 0x105   :  { %v672_v54 = vmul.f32 0.1, %v466_v44  ;;  %v704_v55 = vmul.f32 0.1, %v594_v45  ;;  %v469_v56 = vadd.f32 %v1227_v35, %v468_v52  ;;  %v597_v57 = vadd.f32 %v1227_v35, %v596_v53 }
 0x106   :  { %v738_v58 = vmax.f32 %v474_v40, %v674_v48  ;;  %v770_v59 = vmax.f32 %v602_v41, %v706_v49  ;;  %v675_v60 = vmul.f32 0.1, %v477_v50  ;;  %v707_v61 = vmul.f32 0.1, %v605_v51 }
 0x107   :  { %v736_v62 = vmax.f32 %v466_v44, %v672_v54  ;;  %v768_v63 = vmax.f32 %v594_v45, %v704_v55  ;;  %v673_v0 = vmul.f32 0.1, %v469_v56  ;;  %v705_v1 = vmul.f32 0.1, %v597_v57 }
 0x108   :  { %803 = vst.msk [vmem:[%s1552_s3 + $0x90] sm:$0xff] %vm784_vm1, %v738_v58  ;;  %835 = vst.msk [vmem:[%s1552_s3 + $0x190] sm:$0xff] %vm784_vm1, %v770_v59  ;;  %v739_v2 = vmax.f32 %v477_v50, %v675_v60  ;;  %v771_v3 = vmax.f32 %v605_v51, %v707_v61 }
 0x109   :  { %801 = vst.msk [vmem:[%s1552_s3 + $0x80] sm:$0xff] %vm784_vm1, %v736_v62  ;;  %833 = vst.msk [vmem:[%s1552_s3 + $0x180] sm:$0xff] %vm784_vm1, %v768_v63  ;;  %v737_v4 = vmax.f32 %v469_v56, %v673_v0  ;;  %v769_v5 = vmax.f32 %v597_v57, %v705_v1  ;;  %v984_v6 = vpop.f32.mrb[20].mxu0  ;;  %v1016_v7 = vpop.f32.mrb[20].mxu1 }
 0x10a   :  { %804 = vst.msk [vmem:[%s1552_s3 + $0x98] sm:$0xff] %vm784_vm1, %v739_v2  ;;  %836 = vst.msk [vmem:[%s1552_s3 + $0x198] sm:$0xff] %vm784_vm1, %v771_v3  ;;  %v490_v8 = vadd.f32 %v984_v6, %v1227_v35  ;;  %v618_v9 = vadd.f32 %v1016_v7, %v1227_v35  ;;  %v481_v10 = vpop.f32.mrb[21].mxu0  ;;  %v609_v11 = vpop.f32.mrb[21].mxu1 }
 0x10b   :  { %802 = vst.msk [vmem:[%s1552_s3 + $0x88] sm:$0xff] %vm784_vm1, %v737_v4  ;;  %834 = vst.msk [vmem:[%s1552_s3 + $0x188] sm:$0xff] %vm784_vm1, %v769_v5  ;;  %v482_v12 = vadd.f32 %v1227_v35, %v481_v10  ;;  %v610_v13 = vadd.f32 %v1227_v35, %v609_v11  ;;  %v985_v14 = vpop.f32.mrb[22].mxu0  ;;  %v1017_v15 = vpop.f32.mrb[22].mxu1 }
 0x10c   :  { %v678_v16 = vmul.f32 0.1, %v490_v8  ;;  %v710_v17 = vmul.f32 0.1, %v618_v9  ;;  %v493_v18 = vadd.f32 %v985_v14, %v1227_v35  ;;  %v621_v19 = vadd.f32 %v1017_v15, %v1227_v35  ;;  %v484_v20 = vpop.f32.mrb[23].mxu0  ;;  %v612_v21 = vpop.f32.mrb[23].mxu1 }
 0x10d   :  { %v676_v22 = vmul.f32 0.1, %v482_v12  ;;  %v708_v23 = vmul.f32 0.1, %v610_v13  ;;  %v485_v24 = vadd.f32 %v1227_v35, %v484_v20  ;;  %v613_v25 = vadd.f32 %v1227_v35, %v612_v21 }
 0x10e   :  { %v742_v26 = vmax.f32 %v490_v8, %v678_v16  ;;  %v774_v27 = vmax.f32 %v618_v9, %v710_v17  ;;  %v679_v28 = vmul.f32 0.1, %v493_v18  ;;  %v711_v29 = vmul.f32 0.1, %v621_v19 }
 0x10f   :  { %v740_v30 = vmax.f32 %v482_v12, %v676_v22  ;;  %v772_v31 = vmax.f32 %v610_v13, %v708_v23  ;;  %v677_v32 = vmul.f32 0.1, %v485_v24  ;;  %v709_v33 = vmul.f32 0.1, %v613_v25 }
 0x110   :  { %807 = vst.msk [vmem:[%s1552_s3 + $0xb0] sm:$0xff] %vm784_vm1, %v742_v26  ;;  %839 = vst.msk [vmem:[%s1552_s3 + $0x1b0] sm:$0xff] %vm784_vm1, %v774_v27  ;;  %v743_v34 = vmax.f32 %v493_v18, %v679_v28  ;;  %v775_v36 = vmax.f32 %v621_v19, %v711_v29 }
 0x111   :  { %805 = vst.msk [vmem:[%s1552_s3 + $0xa0] sm:$0xff] %vm784_vm1, %v740_v30  ;;  %837 = vst.msk [vmem:[%s1552_s3 + $0x1a0] sm:$0xff] %vm784_vm1, %v772_v31  ;;  %v741_v37 = vmax.f32 %v485_v24, %v677_v32  ;;  %v773_v38 = vmax.f32 %v613_v25, %v709_v33  ;;  %v988_v39 = vpop.f32.mrb[24].mxu0  ;;  %v1020_v40 = vpop.f32.mrb[24].mxu1 }
 0x112   :  { %808 = vst.msk [vmem:[%s1552_s3 + $0xb8] sm:$0xff] %vm784_vm1, %v743_v34  ;;  %840 = vst.msk [vmem:[%s1552_s3 + $0x1b8] sm:$0xff] %vm784_vm1, %v775_v36  ;;  %v506_v41 = vadd.f32 %v988_v39, %v1227_v35  ;;  %v634_v42 = vadd.f32 %v1020_v40, %v1227_v35  ;;  %v497_v43 = vpop.f32.mrb[25].mxu0  ;;  %v625_v44 = vpop.f32.mrb[25].mxu1 }
 0x113   :  { %806 = vst.msk [vmem:[%s1552_s3 + $0xa8] sm:$0xff] %vm784_vm1, %v741_v37  ;;  %838 = vst.msk [vmem:[%s1552_s3 + $0x1a8] sm:$0xff] %vm784_vm1, %v773_v38  ;;  %v498_v45 = vadd.f32 %v1227_v35, %v497_v43  ;;  %v626_v46 = vadd.f32 %v1227_v35, %v625_v44  ;;  %v989_v47 = vpop.f32.mrb[26].mxu0  ;;  %v1021_v48 = vpop.f32.mrb[26].mxu1 }
 0x114   :  { %v682_v49 = vmul.f32 0.1, %v506_v41  ;;  %v714_v50 = vmul.f32 0.1, %v634_v42  ;;  %v509_v51 = vadd.f32 %v989_v47, %v1227_v35  ;;  %v637_v52 = vadd.f32 %v1021_v48, %v1227_v35  ;;  %v500_v53 = vpop.f32.mrb[27].mxu0  ;;  %v628_v54 = vpop.f32.mrb[27].mxu1 }
 0x115   :  { %v680_v55 = vmul.f32 0.1, %v498_v45  ;;  %v712_v56 = vmul.f32 0.1, %v626_v46  ;;  %v501_v57 = vadd.f32 %v1227_v35, %v500_v53  ;;  %v629_v58 = vadd.f32 %v1227_v35, %v628_v54 }
 0x116   :  { %v746_v59 = vmax.f32 %v506_v41, %v682_v49  ;;  %v778_v60 = vmax.f32 %v634_v42, %v714_v50  ;;  %v683_v61 = vmul.f32 0.1, %v509_v51  ;;  %v715_v62 = vmul.f32 0.1, %v637_v52 }
 0x117   :  { %v744_v63 = vmax.f32 %v498_v45, %v680_v55  ;;  %v776_v0 = vmax.f32 %v626_v46, %v712_v56  ;;  %v681_v1 = vmul.f32 0.1, %v501_v57  ;;  %v713_v2 = vmul.f32 0.1, %v629_v58 }
 0x118   :  { %811 = vst.msk [vmem:[%s1552_s3 + $0xd0] sm:$0xff] %vm784_vm1, %v746_v59  ;;  %843 = vst.msk [vmem:[%s1552_s3 + $0x1d0] sm:$0xff] %vm784_vm1, %v778_v60  ;;  %v747_v3 = vmax.f32 %v509_v51, %v683_v61  ;;  %v779_v4 = vmax.f32 %v637_v52, %v715_v62 }
 0x119   :  { %809 = vst.msk [vmem:[%s1552_s3 + $0xc0] sm:$0xff] %vm784_vm1, %v744_v63  ;;  %841 = vst.msk [vmem:[%s1552_s3 + $0x1c0] sm:$0xff] %vm784_vm1, %v776_v0  ;;  %v745_v5 = vmax.f32 %v501_v57, %v681_v1  ;;  %v777_v6 = vmax.f32 %v629_v58, %v713_v2  ;;  %v992_v7 = vpop.f32.mrb[28].mxu0  ;;  %v1024_v8 = vpop.f32.mrb[28].mxu1 }
 0x11a   :  { %812 = vst.msk [vmem:[%s1552_s3 + $0xd8] sm:$0xff] %vm784_vm1, %v747_v3  ;;  %844 = vst.msk [vmem:[%s1552_s3 + $0x1d8] sm:$0xff] %vm784_vm1, %v779_v4  ;;  %v522_v9 = vadd.f32 %v992_v7, %v1227_v35  ;;  %v650_v10 = vadd.f32 %v1024_v8, %v1227_v35  ;;  %v513_v11 = vpop.f32.mrb[29].mxu0  ;;  %v641_v12 = vpop.f32.mrb[29].mxu1 }
 0x11b   :  { %810 = vst.msk [vmem:[%s1552_s3 + $0xc8] sm:$0xff] %vm784_vm1, %v745_v5  ;;  %842 = vst.msk [vmem:[%s1552_s3 + $0x1c8] sm:$0xff] %vm784_vm1, %v777_v6  ;;  %v514_v13 = vadd.f32 %v1227_v35, %v513_v11  ;;  %v642_v14 = vadd.f32 %v1227_v35, %v641_v12  ;;  %v993_v15 = vpop.f32.mrb[30].mxu0  ;;  %v1025_v16 = vpop.f32.mrb[30].mxu1 }
 0x11c   :  { %v686_v17 = vmul.f32 0.1, %v522_v9  ;;  %v718_v18 = vmul.f32 0.1, %v650_v10  ;;  %v525_v19 = vadd.f32 %v993_v15, %v1227_v35  ;;  %v653_v20 = vadd.f32 %v1025_v16, %v1227_v35  ;;  %v516_v21 = vpop.f32.mrb[31].mxu0  ;;  %v644_v22 = vpop.f32.mrb[31].mxu1 }
 0x11d   :  { %v684_v23 = vmul.f32 0.1, %v514_v13  ;;  %v716_v24 = vmul.f32 0.1, %v642_v14  ;;  %v517_v25 = vadd.f32 %v1227_v35, %v516_v21  ;;  %v645_v26 = vadd.f32 %v1227_v35, %v644_v22 }
 0x11e   :  { %v750_v27 = vmax.f32 %v522_v9, %v686_v17  ;;  %v782_v28 = vmax.f32 %v650_v10, %v718_v18  ;;  %v687_v29 = vmul.f32 0.1, %v525_v19  ;;  %v719_v30 = vmul.f32 0.1, %v653_v20 }
 0x11f   :  { %v748_v31 = vmax.f32 %v514_v13, %v684_v23  ;;  %v780_v32 = vmax.f32 %v642_v14, %v716_v24  ;;  %v685_v33 = vmul.f32 0.1, %v517_v25  ;;  %v717_v34 = vmul.f32 0.1, %v645_v26 }
 0x120   :  { %815 = vst.msk [vmem:[%s1552_s3 + $0xf0] sm:$0xff] %vm784_vm1, %v750_v27  ;;  %847 = vst.msk [vmem:[%s1552_s3 + $0x1f0] sm:$0xff] %vm784_vm1, %v782_v28  ;;  %v751_v36 = vmax.f32 %v525_v19, %v687_v29  ;;  %v783_v35 = vmax.f32 %v653_v20, %v719_v30 }
 0x121   :  { %813 = vst.msk [vmem:[%s1552_s3 + $0xe0] sm:$0xff] %vm784_vm1, %v748_v31  ;;  %845 = vst.msk [vmem:[%s1552_s3 + $0x1e0] sm:$0xff] %vm784_vm1, %v780_v32  ;;  %v749_v37 = vmax.f32 %v517_v25, %v685_v33  ;;  %v781_v38 = vmax.f32 %v645_v26, %v717_v34 }
 0x122   :  { %816 = vst.msk [vmem:[%s1552_s3 + $0xf8] sm:$0xff] %vm784_vm1, %v751_v36  ;;  %848 = vst.msk [vmem:[%s1552_s3 + $0x1f8] sm:$0xff] %vm784_vm1, %v783_v35 }
 0x123   :  { %814 = vst.msk [vmem:[%s1552_s3 + $0xe8] sm:$0xff] %vm784_vm1, %v749_v37  ;;  %846 = vst.msk [vmem:[%s1552_s3 + $0x1e8] sm:$0xff] %vm784_vm1, %v781_v38 }

// kernel: discriminator_forward.6
= control target key start
LH: loop header
LB: loop body
LE: loop exit
PB: predicated region body
PF: predicated region fallthrough
CT: control target
= control target key end

     0   :  { %vm375_vm0 = vcmask 261120   ;;  %s750_s1 = inlined_call_operand.vmem [shape: bf16[256,32], index: 1, kind: input, shape index: {}]   ;;  %s751_s0 = inlined_call_operand.vmem [shape: bf16[128,256], index: 0, kind: input, shape index: {}]   ;;  %s752_s2 = inlined_call_operand.vmem [shape: f32[1,32], index: 2, kind: input, shape index: {}]   ;;  %s753_s3 = inlined_call_operand.vmem [shape: f32[128,32], index: 3, kind: output, shape index: {}]  }
   0x1   :  { %v509_v0 = vld [vmem:[%s750_s1 + $0x40] sm:$0xff]   ;;  %v511_v2 = vld [vmem:[%s750_s1 + $0x48] sm:$0xff]   ;;  %v513_v4 = vld [vmem:[%s750_s1 + $0x50] sm:$0xff]  }
   0x2   :  { %v510_v1 = vld [vmem:[%s750_s1] sm:$0xff]   ;;  %429 = vmatprep.subr.bf16.mxu0 %v509_v0  ;;  %493 = vmatprep.subr.bf16.mxu1 %v509_v0  ;;  %v512_v3 = vld [vmem:[%s750_s1 + $0x8] sm:$0xff]   ;;  %v514_v5 = vld [vmem:[%s750_s1 + $0x10] sm:$0xff]  }
   0x3   :  { %430 = vmatpush3.bf16.msra.mxu0 %v510_v1  ;;  %501 = vmatpush3.bf16.msra.mxu1 %v510_v1  ;;  %v515_v6 = vld [vmem:[%s750_s1 + $0x58] sm:$0xff]   ;;  %v517_v8 = vld [vmem:[%s750_s1 + $0x60] sm:$0xff]   ;;  %v519_v10 = vld [vmem:[%s750_s1 + $0x68] sm:$0xff]  }
   0x4   :  { %431 = vmatprep.subr.bf16.mxu0 %v511_v2  ;;  %494 = vmatprep.subr.bf16.mxu1 %v511_v2  ;;  %v516_v7 = vld [vmem:[%s750_s1 + $0x18] sm:$0xff]   ;;  %v518_v9 = vld [vmem:[%s750_s1 + $0x20] sm:$0xff]   ;;  %v520_v13 = vld [vmem:[%s750_s1 + $0x28] sm:$0xff]  }
   0x5   :  { %v527_v11 = vld [vmem:[%s751_s0 + $0x4] ss:$8 sps:$4 sm:$0xff]   ;;  %v521_v14 = vld [vmem:[%s750_s1 + $0x70] sm:$0xff]   ;;  %v523_v16 = vld [vmem:[%s750_s1 + $0x78] sm:$0xff]  }
   0x6   :  { %v530_v12 = vld [vmem:[%s751_s0 + $0x44] ss:$8 sps:$4 sm:$0xff]   ;;  %278 = vmatprep.mubr.bf16.mxu0 %v527_v11  ;;  %v522_v15 = vld [vmem:[%s750_s1 + $0x30] sm:$0xff]   ;;  %v524_v17 = vld [vmem:[%s750_s1 + $0x38] sm:$0xff]  }
   0x7   :  { %432 = vmatpush3.bf16.msra.mxu0 %v512_v3  ;;  %502 = vmatpush3.bf16.msra.mxu1 %v512_v3  ;;  %v525_v18 = vld [vmem:[%s751_s0] ss:$8 sps:$4 sm:$0xff]   ;;  %v531_v20 = vld [vmem:[%s751_s0 + $0x14] ss:$8 sps:$4 sm:$0xff]   ;;  %v535_v22 = vld [vmem:[%s751_s0 + $0x10] ss:$8 sps:$4 sm:$0xff]  }
   0x8   :  { %433 = vmatprep.subr.bf16.mxu0 %v513_v4  ;;  %495 = vmatprep.subr.bf16.mxu1 %v513_v4  ;;  %v528_v19 = vld [vmem:[%s751_s0 + $0x40] ss:$8 sps:$4 sm:$0xff]   ;;  %v533_v21 = vld [vmem:[%s751_s0 + $0x54] ss:$8 sps:$4 sm:$0xff]   ;;  %v536_v23 = vld [vmem:[%s751_s0 + $0x50] ss:$8 sps:$4 sm:$0xff]  }
   0x9   :  { %310 = vmatprep.mubr.bf16.mxu1 %v530_v12  ;;  %v537_v24 = vld [vmem:[%s751_s0 + $0x24] ss:$8 sps:$4 sm:$0xff]   ;;  %v541_v26 = vld [vmem:[%s751_s0 + $0x20] ss:$8 sps:$4 sm:$0xff]   ;;  %v543_v28 = vld [vmem:[%s751_s0 + $0x34] ss:$8 sps:$4 sm:$0xff]  }
   0xa   :  { %v539_v25 = vld [vmem:[%s751_s0 + $0x64] ss:$8 sps:$4 sm:$0xff]   ;;  %v542_v27 = vld [vmem:[%s751_s0 + $0x60] ss:$8 sps:$4 sm:$0xff]   ;;  %v545_v29 = vld [vmem:[%s751_s0 + $0x74] ss:$8 sps:$4 sm:$0xff]  }
   0xb   :  { %434 = vmatpush3.bf16.msra.mxu0 %v514_v5  ;;  %503 = vmatpush3.bf16.msra.mxu1 %v514_v5  ;;  %v547_v30 = vld [vmem:[%s751_s0 + $0x30] ss:$8 sps:$4 sm:$0xff]   ;;  %v668_v34 = vld [vmem:[%s752_s2] ss:$0 sm:$0xff] }
   0xc   :  { %435 = vmatprep.subr.bf16.mxu0 %v515_v6  ;;  %496 = vmatprep.subr.bf16.mxu1 %v515_v6  ;;  %v548_v31 = vld [vmem:[%s751_s0 + $0x70] ss:$8 sps:$4 sm:$0xff]  }
   0xf   :  { %436 = vmatpush3.bf16.msra.mxu0 %v516_v7  ;;  %504 = vmatpush3.bf16.msra.mxu1 %v516_v7 }
  0x10   :  { %437 = vmatprep.subr.bf16.mxu0 %v517_v8  ;;  %497 = vmatprep.subr.bf16.mxu1 %v517_v8 }
  0x13   :  { %438 = vmatpush3.bf16.msra.mxu0 %v518_v9  ;;  %505 = vmatpush3.bf16.msra.mxu1 %v518_v9 }
  0x14   :  { %439 = vmatprep.subr.bf16.mxu0 %v519_v10  ;;  %498 = vmatprep.subr.bf16.mxu1 %v519_v10 }
  0x17   :  { %440 = vmatpush3.bf16.msra.mxu0 %v520_v13  ;;  %506 = vmatpush3.bf16.msra.mxu1 %v520_v13 }
  0x18   :  { %441 = vmatprep.subr.bf16.mxu0 %v521_v14  ;;  %499 = vmatprep.subr.bf16.mxu1 %v521_v14 }
  0x1b   :  { %442 = vmatpush3.bf16.msra.mxu0 %v522_v15  ;;  %507 = vmatpush3.bf16.msra.mxu1 %v522_v15 }
  0x1c   :  { %443 = vmatprep.subr.bf16.mxu0 %v523_v16  ;;  %500 = vmatprep.subr.bf16.mxu1 %v523_v16 }
  0x1f   :  { %444 = vmatpush3.bf16.msra.mxu0 %v524_v17  ;;  %508 = vmatpush3.bf16.msra.mxu1 %v524_v17 }
  0x22   :  { %279 = vmatmul.mubr.bf16.vlgmr.msra.gmra.mrb[0].mxu0 %v525_v18  ;;  %311 = vmatmul.mubr.bf16.vlgmr.msra.gmra.mrb[0].mxu1 %v528_v19 }
  0x23   :  { %286 = vmatprep.mubr.bf16.mxu0 %v531_v20  ;;  %318 = vmatprep.mubr.bf16.mxu1 %v533_v21 }
  0x2a   :  { %287 = vmatmul.mubr.bf16.gmra.mrb[4].mxu0 %v535_v22  ;;  %319 = vmatmul.mubr.bf16.gmra.mrb[4].mxu1 %v536_v23 }
  0x2b   :  { %294 = vmatprep.mubr.bf16.mxu0 %v537_v24  ;;  %326 = vmatprep.mubr.bf16.mxu1 %v539_v25 }
  0x32   :  { %295 = vmatmul.mubr.bf16.gmra.mrb[8].mxu0 %v541_v26  ;;  %327 = vmatmul.mubr.bf16.gmra.mrb[8].mxu1 %v542_v27 }
  0x33   :  { %302 = vmatprep.mubr.bf16.mxu0 %v543_v28  ;;  %334 = vmatprep.mubr.bf16.mxu1 %v545_v29 }
  0x3a   :  { %303 = vmatmul.mubr.bf16.gmra.mrb[12].mxu0 %v547_v30  ;;  %335 = vmatmul.mubr.bf16.gmra.mrb[12].mxu1 %v548_v31 }
  0xf5   :  { %v445_v32 = vpop.f32.mrb[0].mxu0  ;;  %v469_v33 = vpop.f32.mrb[0].mxu1 }
  0xf6   :  { %v446_v35 = vpop.f32.mrb[1].mxu0  ;;  %v470_v36 = vpop.f32.mrb[1].mxu1 }
  0xf7   :  { %v447_v37 = vadd.f32 %v446_v35, %v445_v32  ;;  %v471_v38 = vadd.f32 %v470_v36, %v469_v33  ;;  %v448_v39 = vpop.f32.mrb[2].mxu0  ;;  %v472_v40 = vpop.f32.mrb[2].mxu1 }
  0xf8   :  { %v449_v41 = vpop.f32.mrb[3].mxu0  ;;  %v473_v42 = vpop.f32.mrb[3].mxu1 }
  0xf9   :  { %v281_v43 = vadd.f32 %v447_v37, %v668_v34  ;;  %v313_v44 = vadd.f32 %v471_v38, %v668_v34  ;;  %v450_v45 = vadd.f32 %v449_v41, %v448_v39  ;;  %v474_v46 = vadd.f32 %v473_v42, %v472_v40 }
  0xfb   :  { %v343_v47 = vmul.f32 0.1, %v281_v43  ;;  %v351_v48 = vmul.f32 0.1, %v313_v44  ;;  %v284_v49 = vadd.f32 %v450_v45, %v668_v34  ;;  %v316_v50 = vadd.f32 %v474_v46, %v668_v34 }
  0xfd   :  { %v359_v51 = vmax.f32 %v281_v43, %v343_v47  ;;  %v367_v52 = vmax.f32 %v313_v44, %v351_v48  ;;  %v344_v53 = vmul.f32 0.1, %v284_v49  ;;  %v352_v54 = vmul.f32 0.1, %v316_v50  ;;  %v451_v55 = vpop.f32.mrb[4].mxu0  ;;  %v475_v56 = vpop.f32.mrb[4].mxu1 }
  0xfe   :  { %v452_v57 = vpop.f32.mrb[5].mxu0  ;;  %v476_v58 = vpop.f32.mrb[5].mxu1 }
  0xff   :  { %376 = vst.msk [vmem:[%s753_s3] sm:$0xff] %vm375_vm0, %v359_v51  ;;  %384 = vst.msk [vmem:[%s753_s3 + $0x40] sm:$0xff] %vm375_vm0, %v367_v52  ;;  %v360_v59 = vmax.f32 %v284_v49, %v344_v53  ;;  %v368_v60 = vmax.f32 %v316_v50, %v352_v54  ;;  %v453_v61 = vadd.f32 %v452_v57, %v451_v55  ;;  %v454_v63 = vpop.f32.mrb[6].mxu0  ;;  %v478_v0 = vpop.f32.mrb[6].mxu1 }
 0x100   :  { %v477_v62 = vadd.f32 %v476_v58, %v475_v56  ;;  %v455_v1 = vpop.f32.mrb[7].mxu0  ;;  %v479_v2 = vpop.f32.mrb[7].mxu1 }
 0x101   :  { %377 = vst.msk [vmem:[%s753_s3 + $0x8] sm:$0xff] %vm375_vm0, %v360_v59  ;;  %385 = vst.msk [vmem:[%s753_s3 + $0x48] sm:$0xff] %vm375_vm0, %v368_v60  ;;  %v289_v3 = vadd.f32 %v453_v61, %v668_v34  ;;  %v456_v5 = vadd.f32 %v455_v1, %v454_v63  ;;  %v480_v6 = vadd.f32 %v479_v2, %v478_v0 }
 0x102   :  { %v321_v4 = vadd.f32 %v477_v62, %v668_v34 }
 0x103   :  { %v345_v7 = vmul.f32 0.1, %v289_v3  ;;  %v292_v9 = vadd.f32 %v456_v5, %v668_v34  ;;  %v324_v10 = vadd.f32 %v480_v6, %v668_v34 }
 0x104   :  { %v353_v8 = vmul.f32 0.1, %v321_v4 }
 0x105   :  { %v361_v11 = vmax.f32 %v289_v3, %v345_v7  ;;  %v346_v13 = vmul.f32 0.1, %v292_v9  ;;  %v354_v14 = vmul.f32 0.1, %v324_v10  ;;  %v457_v15 = vpop.f32.mrb[8].mxu0  ;;  %v481_v16 = vpop.f32.mrb[8].mxu1 }
 0x106   :  { %v369_v12 = vmax.f32 %v321_v4, %v353_v8  ;;  %v458_v17 = vpop.f32.mrb[9].mxu0  ;;  %v482_v18 = vpop.f32.mrb[9].mxu1 }
 0x107   :  { %378 = vst.msk [vmem:[%s753_s3 + $0x10] sm:$0xff] %vm375_vm0, %v361_v11  ;;  %v362_v19 = vmax.f32 %v292_v9, %v346_v13  ;;  %v370_v20 = vmax.f32 %v324_v10, %v354_v14  ;;  %v459_v21 = vadd.f32 %v458_v17, %v457_v15  ;;  %v483_v22 = vadd.f32 %v482_v18, %v481_v16  ;;  %v460_v23 = vpop.f32.mrb[10].mxu0  ;;  %v484_v24 = vpop.f32.mrb[10].mxu1 }
 0x108   :  { %386 = vst.msk [vmem:[%s753_s3 + $0x50] sm:$0xff] %vm375_vm0, %v369_v12  ;;  %v461_v25 = vpop.f32.mrb[11].mxu0  ;;  %v485_v26 = vpop.f32.mrb[11].mxu1 }
 0x109   :  { %379 = vst.msk [vmem:[%s753_s3 + $0x18] sm:$0xff] %vm375_vm0, %v362_v19  ;;  %387 = vst.msk [vmem:[%s753_s3 + $0x58] sm:$0xff] %vm375_vm0, %v370_v20  ;;  %v297_v27 = vadd.f32 %v459_v21, %v668_v34  ;;  %v329_v28 = vadd.f32 %v483_v22, %v668_v34  ;;  %v462_v29 = vadd.f32 %v461_v25, %v460_v23 }
 0x10a   :  { %v486_v30 = vadd.f32 %v485_v26, %v484_v24 }
 0x10b   :  { %v347_v31 = vmul.f32 0.1, %v297_v27  ;;  %v355_v32 = vmul.f32 0.1, %v329_v28  ;;  %v300_v33 = vadd.f32 %v462_v29, %v668_v34 }
 0x10c   :  { %v332_v35 = vadd.f32 %v486_v30, %v668_v34 }
 0x10d   :  { %v363_v36 = vmax.f32 %v297_v27, %v347_v31  ;;  %v371_v37 = vmax.f32 %v329_v28, %v355_v32  ;;  %v348_v38 = vmul.f32 0.1, %v300_v33  ;;  %v463_v40 = vpop.f32.mrb[12].mxu0  ;;  %v487_v41 = vpop.f32.mrb[12].mxu1 }
 0x10e   :  { %v356_v39 = vmul.f32 0.1, %v332_v35  ;;  %v464_v42 = vpop.f32.mrb[13].mxu0  ;;  %v488_v43 = vpop.f32.mrb[13].mxu1 }
 0x10f   :  { %380 = vst.msk [vmem:[%s753_s3 + $0x20] sm:$0xff] %vm375_vm0, %v363_v36  ;;  %388 = vst.msk [vmem:[%s753_s3 + $0x60] sm:$0xff] %vm375_vm0, %v371_v37  ;;  %v364_v44 = vmax.f32 %v300_v33, %v348_v38  ;;  %v465_v46 = vadd.f32 %v464_v42, %v463_v40  ;;  %v489_v47 = vadd.f32 %v488_v43, %v487_v41  ;;  %v466_v48 = vpop.f32.mrb[14].mxu0  ;;  %v490_v49 = vpop.f32.mrb[14].mxu1 }
 0x110   :  { %v372_v45 = vmax.f32 %v332_v35, %v356_v39  ;;  %v467_v50 = vpop.f32.mrb[15].mxu0  ;;  %v491_v51 = vpop.f32.mrb[15].mxu1 }
 0x111   :  { %381 = vst.msk [vmem:[%s753_s3 + $0x28] sm:$0xff] %vm375_vm0, %v364_v44  ;;  %v305_v52 = vadd.f32 %v465_v46, %v668_v34  ;;  %v337_v53 = vadd.f32 %v489_v47, %v668_v34  ;;  %v468_v54 = vadd.f32 %v467_v50, %v466_v48  ;;  %v492_v55 = vadd.f32 %v491_v51, %v490_v49 }
 0x112   :  { %389 = vst.msk [vmem:[%s753_s3 + $0x68] sm:$0xff] %vm375_vm0, %v372_v45 }
 0x113   :  { %v349_v56 = vmul.f32 0.1, %v305_v52  ;;  %v357_v57 = vmul.f32 0.1, %v337_v53  ;;  %v308_v58 = vadd.f32 %v468_v54, %v668_v34  ;;  %v340_v59 = vadd.f32 %v492_v55, %v668_v34 }
 0x115   :  { %v365_v60 = vmax.f32 %v305_v52, %v349_v56  ;;  %v373_v61 = vmax.f32 %v337_v53, %v357_v57  ;;  %v350_v62 = vmul.f32 0.1, %v308_v58  ;;  %v358_v63 = vmul.f32 0.1, %v340_v59 }
 0x117   :  { %382 = vst.msk [vmem:[%s753_s3 + $0x30] sm:$0xff] %vm375_vm0, %v365_v60  ;;  %390 = vst.msk [vmem:[%s753_s3 + $0x70] sm:$0xff] %vm375_vm0, %v373_v61  ;;  %v366_v0 = vmax.f32 %v308_v58, %v350_v62  ;;  %v374_v1 = vmax.f32 %v340_v59, %v358_v63 }
 0x119   :  { %383 = vst.msk [vmem:[%s753_s3 + $0x38] sm:$0xff] %vm375_vm0, %v366_v0  ;;  %391 = vst.msk [vmem:[%s753_s3 + $0x78] sm:$0xff] %vm375_vm0, %v374_v1 }

// kernel: discriminator_forward.7
= control target key start
LH: loop header
LB: loop body
LE: loop exit
PB: predicated region body
PF: predicated region fallthrough
CT: control target
= control target key end

     0   :  { %vm432_vm0 = vcmask 523264   ;;  %s741_s1 = inlined_call_operand.vmem [shape: bf16[512,64], index: 1, kind: input, shape index: {}]   ;;  %s742_s0 = inlined_call_operand.vmem [shape: bf16[32,512], index: 0, kind: input, shape index: {}]   ;;  %s743_s2 = inlined_call_operand.vmem [shape: f32[1,64], index: 2, kind: input, shape index: {}]   ;;  %s744_s3 = inlined_call_operand.vmem [shape: f32[32,64], index: 3, kind: output, shape index: {}]  }
   0x1   :  { %v538_v0 = vld [vmem:[%s741_s1 + $0x40] sm:$0xff]   ;;  %v542_v4 = vld [vmem:[%s741_s1 + $0x48] sm:$0xff]   ;;  %v546_v8 = vld [vmem:[%s741_s1 + $0x50] sm:$0xff]  }
   0x2   :  { %v539_v1 = vld [vmem:[%s741_s1 + $0xc0] sm:$0xff]   ;;  %482 = vmatprep.subr.bf16.mxu0 %v538_v0  ;;  %v543_v5 = vld [vmem:[%s741_s1 + $0xc8] sm:$0xff]   ;;  %v547_v9 = vld [vmem:[%s741_s1 + $0xd0] sm:$0xff]  }
   0x3   :  { %v540_v2 = vld [vmem:[%s741_s1] sm:$0xff]   ;;  %510 = vmatprep.subr.bf16.mxu1 %v539_v1  ;;  %v544_v6 = vld [vmem:[%s741_s1 + $0x8] sm:$0xff]   ;;  %v548_v10 = vld [vmem:[%s741_s1 + $0x10] sm:$0xff]  }
   0x4   :  { %v541_v3 = vld [vmem:[%s741_s1 + $0x80] sm:$0xff]   ;;  %483 = vmatpush3.bf16.msra.mxu0 %v540_v2  ;;  %v545_v7 = vld [vmem:[%s741_s1 + $0x88] sm:$0xff]   ;;  %v549_v11 = vld [vmem:[%s741_s1 + $0x90] sm:$0xff]  }
   0x5   :  { %511 = vmatpush3.bf16.msra.mxu1 %v541_v3  ;;  %484 = vmatprep.subr.bf16.mxu0 %v542_v4  ;;  %v550_v12 = vld [vmem:[%s741_s1 + $0x58] sm:$0xff]   ;;  %v554_v16 = vld [vmem:[%s741_s1 + $0x60] sm:$0xff]   ;;  %v558_v20 = vld [vmem:[%s741_s1 + $0x68] sm:$0xff]  }
   0x6   :  { %512 = vmatprep.subr.bf16.mxu1 %v543_v5  ;;  %v551_v13 = vld [vmem:[%s741_s1 + $0xd8] sm:$0xff]   ;;  %v555_v17 = vld [vmem:[%s741_s1 + $0xe0] sm:$0xff]   ;;  %v559_v21 = vld [vmem:[%s741_s1 + $0xe8] sm:$0xff]  }
   0x7   :  { %v552_v14 = vld [vmem:[%s741_s1 + $0x18] sm:$0xff]   ;;  %v556_v18 = vld [vmem:[%s741_s1 + $0x20] sm:$0xff]   ;;  %v560_v22 = vld [vmem:[%s741_s1 + $0x28] sm:$0xff]  }
   0x8   :  { %485 = vmatpush3.bf16.msra.mxu0 %v544_v6  ;;  %v553_v15 = vld [vmem:[%s741_s1 + $0x98] sm:$0xff]   ;;  %v557_v19 = vld [vmem:[%s741_s1 + $0xa0] sm:$0xff]   ;;  %v561_v23 = vld [vmem:[%s741_s1 + $0xa8] sm:$0xff]  }
   0x9   :  { %513 = vmatpush3.bf16.msra.mxu1 %v545_v7  ;;  %486 = vmatprep.subr.bf16.mxu0 %v546_v8  ;;  %v562_v24 = vld [vmem:[%s741_s1 + $0x70] sm:$0xff]   ;;  %v566_v28 = vld [vmem:[%s741_s1 + $0x78] sm:$0xff]   ;;  %v441_v42 = vld [vmem:[%s743_s2] ss:$0 sm:$0xff] }
   0xa   :  { %514 = vmatprep.subr.bf16.mxu1 %v547_v9  ;;  %v563_v25 = vld [vmem:[%s741_s1 + $0xf0] sm:$0xff]   ;;  %v567_v29 = vld [vmem:[%s741_s1 + $0xf8] sm:$0xff]  }
   0xb   :  { %v564_v26 = vld [vmem:[%s741_s1 + $0x30] sm:$0xff]   ;;  %v568_v30 = vld [vmem:[%s741_s1 + $0x38] sm:$0xff]  }
   0xc   :  { %487 = vmatpush3.bf16.msra.mxu0 %v548_v10  ;;  %v565_v27 = vld [vmem:[%s741_s1 + $0xb0] sm:$0xff]   ;;  %v569_v31 = vld [vmem:[%s741_s1 + $0xb8] sm:$0xff]  }
   0xd   :  { %515 = vmatpush3.bf16.msra.mxu1 %v549_v11  ;;  %488 = vmatprep.subr.bf16.mxu0 %v550_v12  ;;  %v570_v32 = vld [vmem:[%s742_s0] ss:$16 sps:$4 sm:$0xff]   ;;  %v572_v33 = vld [vmem:[%s742_s0 + $0x4] ss:$16 sps:$4 sm:$0xff]   ;;  %v573_v34 = vld [vmem:[%s742_s0 + $0x8] ss:$16 sps:$4 sm:$0xff]  }
   0xe   :  { %516 = vmatprep.subr.bf16.mxu1 %v551_v13  ;;  %v575_v35 = vld [vmem:[%s742_s0 + $0xc] ss:$16 sps:$4 sm:$0xff]   ;;  %358 = vmatprep.mubr.bf16.mxu0 %v572_v33  ;;  %v576_v36 = vld [vmem:[%s742_s0 + $0x24] ss:$16 sps:$4 sm:$0xff]   ;;  %v580_v38 = vld [vmem:[%s742_s0 + $0x20] ss:$16 sps:$4 sm:$0xff]  }
   0xf   :  { %407 = vmatprep.mubr.bf16.mxu1 %v575_v35  ;;  %v578_v37 = vld [vmem:[%s742_s0 + $0x2c] ss:$16 sps:$4 sm:$0xff]   ;;  %v581_v39 = vld [vmem:[%s742_s0 + $0x28] ss:$16 sps:$4 sm:$0xff]  }
  0x10   :  { %489 = vmatpush3.bf16.msra.mxu0 %v552_v14 }
  0x11   :  { %517 = vmatpush3.bf16.msra.mxu1 %v553_v15  ;;  %490 = vmatprep.subr.bf16.mxu0 %v554_v16 }
  0x12   :  { %518 = vmatprep.subr.bf16.mxu1 %v555_v17 }
  0x14   :  { %491 = vmatpush3.bf16.msra.mxu0 %v556_v18 }
  0x15   :  { %519 = vmatpush3.bf16.msra.mxu1 %v557_v19  ;;  %492 = vmatprep.subr.bf16.mxu0 %v558_v20 }
  0x16   :  { %520 = vmatprep.subr.bf16.mxu1 %v559_v21 }
  0x18   :  { %493 = vmatpush3.bf16.msra.mxu0 %v560_v22 }
  0x19   :  { %521 = vmatpush3.bf16.msra.mxu1 %v561_v23  ;;  %494 = vmatprep.subr.bf16.mxu0 %v562_v24 }
  0x1a   :  { %522 = vmatprep.subr.bf16.mxu1 %v563_v25 }
  0x1c   :  { %495 = vmatpush3.bf16.msra.mxu0 %v564_v26 }
  0x1d   :  { %523 = vmatpush3.bf16.msra.mxu1 %v565_v27  ;;  %496 = vmatprep.subr.bf16.mxu0 %v566_v28 }
  0x1e   :  { %524 = vmatprep.subr.bf16.mxu1 %v567_v29 }
  0x20   :  { %497 = vmatpush3.bf16.msra.mxu0 %v568_v30 }
  0x21   :  { %525 = vmatpush3.bf16.msra.mxu1 %v569_v31 }
  0x23   :  { %359 = vmatmul.mubr.bf16.vlgmr.msra.gmra.mrb[0].mxu0 %v570_v32 }
  0x24   :  { %408 = vmatmul.mubr.bf16.vlgmr.msra.gmra.mrb[0].mxu1 %v573_v34  ;;  %366 = vmatprep.mubr.bf16.mxu0 %v576_v36 }
  0x25   :  { %415 = vmatprep.mubr.bf16.mxu1 %v578_v37 }
  0x2b   :  { %367 = vmatmul.mubr.bf16.gmra.mrb[4].mxu0 %v580_v38 }
  0x2c   :  { %416 = vmatmul.mubr.bf16.gmra.mrb[4].mxu1 %v581_v39 }
  0xf6   :  { %v498_v40 = vpop.f32.mrb[0].mxu0 }
  0xf7   :  { %v526_v41 = vpop.f32.mrb[0].mxu1  ;;  %v499_v43 = vpop.f32.mrb[1].mxu0 }
  0xf8   :  { %v500_v44 = vadd.f32 %v499_v43, %v498_v40  ;;  %v527_v45 = vpop.f32.mrb[1].mxu1  ;;  %v501_v46 = vpop.f32.mrb[2].mxu0 }
  0xf9   :  { %v528_v47 = vadd.f32 %v527_v45, %v526_v41  ;;  %v529_v48 = vpop.f32.mrb[2].mxu1  ;;  %v502_v49 = vpop.f32.mrb[3].mxu0 }
  0xfa   :  { %v361_v50 = vadd.f32 %v500_v44, %v441_v42  ;;  %v503_v51 = vadd.f32 %v502_v49, %v501_v46  ;;  %v530_v52 = vpop.f32.mrb[3].mxu1 }
  0xfb   :  { %v531_v53 = vadd.f32 %v530_v52, %v529_v48 }
  0xfc   :  { %v410_v54 = vadd.f32 %v528_v47, %v361_v50  ;;  %v364_v55 = vadd.f32 %v503_v51, %v441_v42 }
  0xfe   :  { %v424_v56 = vmul.f32 0.1, %v410_v54  ;;  %v413_v57 = vadd.f32 %v531_v53, %v364_v55  ;;  %v504_v58 = vpop.f32.mrb[4].mxu0 }
  0xff   :  { %v532_v59 = vpop.f32.mrb[4].mxu1  ;;  %v505_v60 = vpop.f32.mrb[5].mxu0 }
 0x100   :  { %v428_v61 = vmax.f32 %v410_v54, %v424_v56  ;;  %v425_v62 = vmul.f32 0.1, %v413_v57  ;;  %v506_v63 = vadd.f32 %v505_v60, %v504_v58  ;;  %v533_v0 = vpop.f32.mrb[5].mxu1  ;;  %v507_v1 = vpop.f32.mrb[6].mxu0 }
 0x101   :  { %v534_v2 = vadd.f32 %v533_v0, %v532_v59  ;;  %v535_v3 = vpop.f32.mrb[6].mxu1  ;;  %v508_v4 = vpop.f32.mrb[7].mxu0 }
 0x102   :  { %433 = vst.msk [vmem:[%s744_s3] sm:$0xff] %vm432_vm0, %v428_v61  ;;  %v429_v5 = vmax.f32 %v413_v57, %v425_v62  ;;  %v369_v6 = vadd.f32 %v506_v63, %v441_v42  ;;  %v509_v7 = vadd.f32 %v508_v4, %v507_v1  ;;  %v536_v8 = vpop.f32.mrb[7].mxu1 }
 0x103   :  { %v537_v9 = vadd.f32 %v536_v8, %v535_v3 }
 0x104   :  { %434 = vst.msk [vmem:[%s744_s3 + $0x8] sm:$0xff] %vm432_vm0, %v429_v5  ;;  %v418_v10 = vadd.f32 %v534_v2, %v369_v6  ;;  %v372_v11 = vadd.f32 %v509_v7, %v441_v42 }
 0x106   :  { %v426_v12 = vmul.f32 0.1, %v418_v10  ;;  %v421_v13 = vadd.f32 %v537_v9, %v372_v11 }
 0x108   :  { %v430_v14 = vmax.f32 %v418_v10, %v426_v12  ;;  %v427_v15 = vmul.f32 0.1, %v421_v13 }
 0x10a   :  { %435 = vst.msk [vmem:[%s744_s3 + $0x10] sm:$0xff] %vm432_vm0, %v430_v14  ;;  %v431_v16 = vmax.f32 %v421_v13, %v427_v15 }
 0x10c   :  { %436 = vst.msk [vmem:[%s744_s3 + $0x18] sm:$0xff] %vm432_vm0, %v431_v16 }

// kernel: discriminator_forward.8
= control target key start
LH: loop header
LB: loop body
LE: loop exit
PB: predicated region body
PF: predicated region fallthrough
CT: control target
= control target key end

     0   :  { %s1196_s1 = inlined_call_operand.vmem [shape: bf16[1024,128], index: 1, kind: input, shape index: {}]   ;;  %s1197_s0 = inlined_call_operand.vmem [shape: bf16[8,1024], index: 0, kind: input, shape index: {}]   ;;  %s1198_s2 = inlined_call_operand.vmem [shape: f32[1,128], index: 2, kind: input, shape index: {}]   ;;  %s1199_s3 = inlined_call_operand.vmem [shape: f32[8,128], index: 3, kind: output, shape index: {}]  }
   0x1   :  { %v894_v0 = vld [vmem:[%s1196_s1 + $0x40] sm:$0xff]   ;;  %v898_v4 = vld [vmem:[%s1196_s1 + $0x48] sm:$0xff]   ;;  %v902_v8 = vld [vmem:[%s1196_s1 + $0x50] sm:$0xff]  }
   0x2   :  { %v895_v1 = vld [vmem:[%s1196_s1 + $0xc0] sm:$0xff]   ;;  %806 = vmatprep.subr.bf16.mxu0 %v894_v0  ;;  %v899_v5 = vld [vmem:[%s1196_s1 + $0xc8] sm:$0xff]   ;;  %v903_v9 = vld [vmem:[%s1196_s1 + $0xd0] sm:$0xff]  }
   0x3   :  { %v896_v2 = vld [vmem:[%s1196_s1] sm:$0xff]   ;;  %828 = vmatprep.subr.bf16.mxu1 %v895_v1  ;;  %v900_v6 = vld [vmem:[%s1196_s1 + $0x8] sm:$0xff]   ;;  %v904_v10 = vld [vmem:[%s1196_s1 + $0x10] sm:$0xff]  }
   0x4   :  { %v897_v3 = vld [vmem:[%s1196_s1 + $0x80] sm:$0xff]   ;;  %807 = vmatpush3.bf16.msra.mxu0 %v896_v2  ;;  %v901_v7 = vld [vmem:[%s1196_s1 + $0x88] sm:$0xff]   ;;  %v905_v11 = vld [vmem:[%s1196_s1 + $0x90] sm:$0xff]  }
   0x5   :  { %829 = vmatpush3.bf16.msra.mxu1 %v897_v3  ;;  %808 = vmatprep.subr.bf16.mxu0 %v898_v4  ;;  %v906_v12 = vld [vmem:[%s1196_s1 + $0x58] sm:$0xff]   ;;  %v910_v16 = vld [vmem:[%s1196_s1 + $0x60] sm:$0xff]   ;;  %v914_v20 = vld [vmem:[%s1196_s1 + $0x68] sm:$0xff]  }
   0x6   :  { %830 = vmatprep.subr.bf16.mxu1 %v899_v5  ;;  %v907_v13 = vld [vmem:[%s1196_s1 + $0xd8] sm:$0xff]   ;;  %v911_v17 = vld [vmem:[%s1196_s1 + $0xe0] sm:$0xff]   ;;  %v915_v21 = vld [vmem:[%s1196_s1 + $0xe8] sm:$0xff]  }
   0x7   :  { %v908_v14 = vld [vmem:[%s1196_s1 + $0x18] sm:$0xff]   ;;  %v912_v18 = vld [vmem:[%s1196_s1 + $0x20] sm:$0xff]   ;;  %v916_v22 = vld [vmem:[%s1196_s1 + $0x28] sm:$0xff]  }
   0x8   :  { %809 = vmatpush3.bf16.msra.mxu0 %v900_v6  ;;  %v909_v15 = vld [vmem:[%s1196_s1 + $0x98] sm:$0xff]   ;;  %v913_v19 = vld [vmem:[%s1196_s1 + $0xa0] sm:$0xff]   ;;  %v917_v23 = vld [vmem:[%s1196_s1 + $0xa8] sm:$0xff]  }
   0x9   :  { %831 = vmatpush3.bf16.msra.mxu1 %v901_v7  ;;  %810 = vmatprep.subr.bf16.mxu0 %v902_v8  ;;  %v918_v24 = vld [vmem:[%s1196_s1 + $0x70] sm:$0xff]   ;;  %v922_v28 = vld [vmem:[%s1196_s1 + $0x78] sm:$0xff]   ;;  %v15_v32 = vld [vmem:[%s1197_s0] sm:$0xff] }
   0xa   :  { %832 = vmatprep.subr.bf16.mxu1 %v903_v9  ;;  %v919_v25 = vld [vmem:[%s1196_s1 + $0xf0] sm:$0xff]   ;;  %v923_v29 = vld [vmem:[%s1196_s1 + $0xf8] sm:$0xff]   ;;  %v16_v33 = vld [vmem:[%s1197_s0 + $0x8] sm:$0xff]  ;;  %v734_v34 = vcombine.low %v15_v32, %v15_v32  ;;  %v735_v35 = vcombine.high %v15_v32, %v15_v32 }
   0xb   :  { %v920_v26 = vld [vmem:[%s1196_s1 + $0x30] sm:$0xff]   ;;  %v924_v30 = vld [vmem:[%s1196_s1 + $0x38] sm:$0xff]   ;;  %v736_v36 = vcombine.low %v16_v33, %v16_v33  ;;  %v737_v37 = vcombine.high %v16_v33, %v16_v33  ;;  %v930_v38 = vld [vmem:[%s1196_s1 + $0x140] sm:$0xff]  }
   0xc   :  { %811 = vmatpush3.bf16.msra.mxu0 %v904_v10  ;;  %v921_v27 = vld [vmem:[%s1196_s1 + $0xb0] sm:$0xff]   ;;  %v925_v31 = vld [vmem:[%s1196_s1 + $0xb8] sm:$0xff]   ;;  %v931_v39 = vld [vmem:[%s1196_s1 + $0x1c0] sm:$0xff]   ;;  %598 = vmatprep.mubr.bf16.mxu0 %v735_v35 }
   0xd   :  { %833 = vmatpush3.bf16.msra.mxu1 %v905_v11  ;;  %812 = vmatprep.subr.bf16.mxu0 %v906_v12  ;;  %v932_v40 = vld [vmem:[%s1196_s1 + $0x100] sm:$0xff]   ;;  %v934_v42 = vld [vmem:[%s1196_s1 + $0x148] sm:$0xff]   ;;  %v938_v46 = vld [vmem:[%s1196_s1 + $0x150] sm:$0xff]  }
   0xe   :  { %834 = vmatprep.subr.bf16.mxu1 %v907_v13  ;;  %638 = vmatprep.mubr.bf16.mxu1 %v737_v37  ;;  %v933_v41 = vld [vmem:[%s1196_s1 + $0x180] sm:$0xff]   ;;  %v935_v43 = vld [vmem:[%s1196_s1 + $0x1c8] sm:$0xff]   ;;  %v939_v47 = vld [vmem:[%s1196_s1 + $0x1d0] sm:$0xff]  }
   0xf   :  { %v936_v44 = vld [vmem:[%s1196_s1 + $0x108] sm:$0xff]   ;;  %v940_v48 = vld [vmem:[%s1196_s1 + $0x110] sm:$0xff]   ;;  %v942_v50 = vld [vmem:[%s1196_s1 + $0x158] sm:$0xff]  }
  0x10   :  { %813 = vmatpush3.bf16.msra.mxu0 %v908_v14  ;;  %v937_v45 = vld [vmem:[%s1196_s1 + $0x188] sm:$0xff]   ;;  %v941_v49 = vld [vmem:[%s1196_s1 + $0x190] sm:$0xff]   ;;  %v943_v51 = vld [vmem:[%s1196_s1 + $0x1d8] sm:$0xff]  }
  0x11   :  { %835 = vmatpush3.bf16.msra.mxu1 %v909_v15  ;;  %814 = vmatprep.subr.bf16.mxu0 %v910_v16  ;;  %v944_v52 = vld [vmem:[%s1196_s1 + $0x118] sm:$0xff]   ;;  %v946_v54 = vld [vmem:[%s1196_s1 + $0x160] sm:$0xff]   ;;  %v950_v58 = vld [vmem:[%s1196_s1 + $0x168] sm:$0xff]  }
  0x12   :  { %836 = vmatprep.subr.bf16.mxu1 %v911_v17  ;;  %v945_v53 = vld [vmem:[%s1196_s1 + $0x198] sm:$0xff]   ;;  %v947_v55 = vld [vmem:[%s1196_s1 + $0x1e0] sm:$0xff]   ;;  %v951_v59 = vld [vmem:[%s1196_s1 + $0x1e8] sm:$0xff]  }
  0x13   :  { %v948_v56 = vld [vmem:[%s1196_s1 + $0x120] sm:$0xff]   ;;  %v952_v60 = vld [vmem:[%s1196_s1 + $0x128] sm:$0xff]   ;;  %v954_v62 = vld [vmem:[%s1196_s1 + $0x170] sm:$0xff]  }
  0x14   :  { %815 = vmatpush3.bf16.msra.mxu0 %v912_v18  ;;  %v949_v57 = vld [vmem:[%s1196_s1 + $0x1a0] sm:$0xff]   ;;  %v953_v61 = vld [vmem:[%s1196_s1 + $0x1a8] sm:$0xff]   ;;  %v955_v63 = vld [vmem:[%s1196_s1 + $0x1f0] sm:$0xff]  }
  0x15   :  { %837 = vmatpush3.bf16.msra.mxu1 %v913_v19  ;;  %816 = vmatprep.subr.bf16.mxu0 %v914_v20  ;;  %v956_v0 = vld [vmem:[%s1196_s1 + $0x130] sm:$0xff]   ;;  %v958_v2 = vld [vmem:[%s1196_s1 + $0x178] sm:$0xff]   ;;  %v733_v14 = vld [vmem:[%s1198_s2] ss:$0 sm:$0xff] }
  0x16   :  { %838 = vmatprep.subr.bf16.mxu1 %v915_v21  ;;  %v957_v1 = vld [vmem:[%s1196_s1 + $0x1b0] sm:$0xff]   ;;  %v959_v3 = vld [vmem:[%s1196_s1 + $0x1f8] sm:$0xff]  }
  0x17   :  { %v960_v4 = vld [vmem:[%s1196_s1 + $0x138] sm:$0xff]   ;;  %v17_v6 = vld [vmem:[%s1197_s0 + $0x10] sm:$0xff] }
  0x18   :  { %817 = vmatpush3.bf16.msra.mxu0 %v916_v22  ;;  %v961_v5 = vld [vmem:[%s1196_s1 + $0x1b8] sm:$0xff]   ;;  %v738_v7 = vcombine.low %v17_v6, %v17_v6  ;;  %v739_v8 = vcombine.high %v17_v6, %v17_v6 }
  0x19   :  { %839 = vmatpush3.bf16.msra.mxu1 %v917_v23  ;;  %818 = vmatprep.subr.bf16.mxu0 %v918_v24  ;;  %v18_v9 = vld [vmem:[%s1197_s0 + $0x18] sm:$0xff] }
  0x1a   :  { %840 = vmatprep.subr.bf16.mxu1 %v919_v25  ;;  %v740_v10 = vcombine.low %v18_v9, %v18_v9  ;;  %v741_v11 = vcombine.high %v18_v9, %v18_v9 }
  0x1c   :  { %819 = vmatpush3.bf16.msra.mxu0 %v920_v26 }
  0x1d   :  { %841 = vmatpush3.bf16.msra.mxu1 %v921_v27  ;;  %820 = vmatprep.subr.bf16.mxu0 %v922_v28 }
  0x1e   :  { %842 = vmatprep.subr.bf16.mxu1 %v923_v29 }
  0x20   :  { %821 = vmatpush3.bf16.msra.mxu0 %v924_v30 }
  0x21   :  { %843 = vmatpush3.bf16.msra.mxu1 %v925_v31  ;;  %850 = vmatprep.subr.bf16.mxu0 %v930_v38 }
  0x22   :  { %872 = vmatprep.subr.bf16.mxu1 %v931_v39 }
  0x23   :  { %599 = vmatmul.mubr.bf16.vlgmr.msra.gmra.mrb[0].mxu0 %v734_v34 }
  0x24   :  { %639 = vmatmul.mubr.bf16.vlgmr.msra.gmra.mrb[0].mxu1 %v736_v36  ;;  %851 = vmatpush3.bf16.msra.mxu0 %v932_v40 }
  0x25   :  { %873 = vmatpush3.bf16.msra.mxu1 %v933_v41  ;;  %852 = vmatprep.subr.bf16.mxu0 %v934_v42 }
  0x26   :  { %874 = vmatprep.subr.bf16.mxu1 %v935_v43  ;;  %678 = vmatprep.mubr.bf16.mxu0 %v739_v8 }
  0x27   :  { %718 = vmatprep.mubr.bf16.mxu1 %v741_v11 }
  0x28   :  { %853 = vmatpush3.bf16.msra.mxu0 %v936_v44 }
  0x29   :  { %875 = vmatpush3.bf16.msra.mxu1 %v937_v45  ;;  %854 = vmatprep.subr.bf16.mxu0 %v938_v46 }
  0x2a   :  { %876 = vmatprep.subr.bf16.mxu1 %v939_v47 }
  0x2c   :  { %855 = vmatpush3.bf16.msra.mxu0 %v940_v48 }
  0x2d   :  { %877 = vmatpush3.bf16.msra.mxu1 %v941_v49  ;;  %856 = vmatprep.subr.bf16.mxu0 %v942_v50 }
  0x2e   :  { %878 = vmatprep.subr.bf16.mxu1 %v943_v51 }
  0x30   :  { %857 = vmatpush3.bf16.msra.mxu0 %v944_v52 }
  0x31   :  { %879 = vmatpush3.bf16.msra.mxu1 %v945_v53  ;;  %858 = vmatprep.subr.bf16.mxu0 %v946_v54 }
  0x32   :  { %880 = vmatprep.subr.bf16.mxu1 %v947_v55 }
  0x34   :  { %859 = vmatpush3.bf16.msra.mxu0 %v948_v56 }
  0x35   :  { %881 = vmatpush3.bf16.msra.mxu1 %v949_v57  ;;  %860 = vmatprep.subr.bf16.mxu0 %v950_v58 }
  0x36   :  { %882 = vmatprep.subr.bf16.mxu1 %v951_v59 }
  0x38   :  { %861 = vmatpush3.bf16.msra.mxu0 %v952_v60 }
  0x39   :  { %883 = vmatpush3.bf16.msra.mxu1 %v953_v61  ;;  %862 = vmatprep.subr.bf16.mxu0 %v954_v62 }
  0x3a   :  { %884 = vmatprep.subr.bf16.mxu1 %v955_v63 }
  0x3c   :  { %863 = vmatpush3.bf16.msra.mxu0 %v956_v0 }
  0x3d   :  { %885 = vmatpush3.bf16.msra.mxu1 %v957_v1  ;;  %864 = vmatprep.subr.bf16.mxu0 %v958_v2 }
  0x3e   :  { %886 = vmatprep.subr.bf16.mxu1 %v959_v3 }
  0x40   :  { %865 = vmatpush3.bf16.msra.mxu0 %v960_v4 }
  0x41   :  { %887 = vmatpush3.bf16.msra.mxu1 %v961_v5 }
  0x43   :  { %679 = vmatmul.mubr.bf16.vlgmr.msra.gmra.mrb[4].mxu0 %v738_v7 }
  0x44   :  { %719 = vmatmul.mubr.bf16.vlgmr.msra.gmra.mrb[4].mxu1 %v740_v10 }
  0xf6   :  { %v822_v12 = vpop.f32.mrb[0].mxu0 }
  0xf7   :  { %v844_v13 = vpop.f32.mrb[0].mxu1  ;;  %v823_v15 = vpop.f32.mrb[1].mxu0 }
  0xf8   :  { %v845_v16 = vpop.f32.mrb[1].mxu1  ;;  %v824_v17 = vadd.f32 %v823_v15, %v822_v12  ;;  %v825_v19 = vpop.f32.mrb[2].mxu0 }
  0xf9   :  { %v846_v18 = vadd.f32 %v845_v16, %v844_v13  ;;  %v847_v20 = vpop.f32.mrb[2].mxu1  ;;  %v826_v21 = vpop.f32.mrb[3].mxu0 }
  0xfa   :  { %v848_v22 = vpop.f32.mrb[3].mxu1  ;;  %v601_v23 = vadd.f32 %v824_v17, %v733_v14 }
  0xfc   :  { %v641_v24 = vadd.f32 %v846_v18, %v601_v23 }
 0x116   :  { %v866_v25 = vpop.f32.mrb[4].mxu0 }
 0x117   :  { %v888_v26 = vpop.f32.mrb[4].mxu1  ;;  %v867_v27 = vpop.f32.mrb[5].mxu0 }
 0x118   :  { %v889_v28 = vpop.f32.mrb[5].mxu1  ;;  %v868_v29 = vadd.f32 %v867_v27, %v866_v25  ;;  %v869_v31 = vpop.f32.mrb[6].mxu0 }
 0x119   :  { %v890_v30 = vadd.f32 %v889_v28, %v888_v26  ;;  %v891_v32 = vpop.f32.mrb[6].mxu1  ;;  %v870_v33 = vpop.f32.mrb[7].mxu0 }
 0x11a   :  { %v892_v34 = vpop.f32.mrb[7].mxu1  ;;  %v681_v35 = vadd.f32 %v868_v29, %v641_v24 }
 0x11c   :  { %v721_v36 = vadd.f32 %v890_v30, %v681_v35 }
 0x11e   :  { %v726_v37 = vmul.f32 0.1, %v721_v36 }
 0x120   :  { %v727_v38 = vmax.f32 %v721_v36, %v726_v37 }
 0x122   :  { %728 = vst [vmem:[%s1199_s3] sm:$0xff] %v727_v38 }

// kernel: discriminator_forward.9
= control target key start
LH: loop header
LB: loop body
LE: loop exit
PB: predicated region body
PF: predicated region fallthrough
CT: control target
= control target key end

     0   :  { %s3521_s1 = inlined_call_operand.vmem [shape: bf16[2048,256], index: 1, kind: input, shape index: {}]   ;;  %s3522_s0 = inlined_call_operand.vmem [shape: bf16[8,2048], index: 0, kind: input, shape index: {}]   ;;  %s3523_s2 = inlined_call_operand.vmem [shape: f32[1,256], index: 2, kind: input, shape index: {}]   ;;  %s3524_s3 = inlined_call_operand.vmem [shape: f32[8,256], index: 3, kind: output, shape index: {}]  }
   0x1   :  { %v2264_v0 = vld [vmem:[%s3521_s1 + $0x4] ss:$8 sps:$4 sm:$0xff]   ;;  %v2268_v2 = vld [vmem:[%s3521_s1] ss:$8 sps:$4 sm:$0xff]   ;;  %v2270_v4 = vld [vmem:[%s3521_s1 + $0x14] ss:$8 sps:$4 sm:$0xff]  }
   0x2   :  { %v2266_v1 = vld [vmem:[%s3521_s1 + $0x404] ss:$8 sps:$4 sm:$0xff]   ;;  %1626 = vmatprep.subr.bf16.mxu1 %v2264_v0  ;;  %v2269_v3 = vld [vmem:[%s3521_s1 + $0x400] ss:$8 sps:$4 sm:$0xff]   ;;  %v2272_v5 = vld [vmem:[%s3521_s1 + $0x414] ss:$8 sps:$4 sm:$0xff]  }
   0x3   :  { %1790 = vmatprep.subr.bf16.mxu0 %v2266_v1  ;;  %1627 = vmatpush1.bf16.msra.mxu1 %v2268_v2  ;;  %v2274_v6 = vld [vmem:[%s3521_s1 + $0x10] ss:$8 sps:$4 sm:$0xff]   ;;  %v2276_v8 = vld [vmem:[%s3521_s1 + $0x24] ss:$8 sps:$4 sm:$0xff]   ;;  %v2280_v10 = vld [vmem:[%s3521_s1 + $0x20] ss:$8 sps:$4 sm:$0xff]  }
   0x4   :  { %1791 = vmatpush1.bf16.msra.mxu0 %v2269_v3  ;;  %1628 = vmatprep.subr.bf16.mxu1 %v2270_v4  ;;  %v2275_v7 = vld [vmem:[%s3521_s1 + $0x410] ss:$8 sps:$4 sm:$0xff]   ;;  %v2278_v9 = vld [vmem:[%s3521_s1 + $0x424] ss:$8 sps:$4 sm:$0xff]   ;;  %v2281_v11 = vld [vmem:[%s3521_s1 + $0x420] ss:$8 sps:$4 sm:$0xff]  }
   0x5   :  { %1792 = vmatprep.subr.bf16.mxu0 %v2272_v5  ;;  %v2282_v12 = vld [vmem:[%s3521_s1 + $0x34] ss:$8 sps:$4 sm:$0xff]   ;;  %v2286_v14 = vld [vmem:[%s3521_s1 + $0x30] ss:$8 sps:$4 sm:$0xff]   ;;  %v2288_v16 = vld [vmem:[%s3521_s1 + $0x44] ss:$8 sps:$4 sm:$0xff]  }
   0x6   :  { %v2284_v13 = vld [vmem:[%s3521_s1 + $0x434] ss:$8 sps:$4 sm:$0xff]   ;;  %v2287_v15 = vld [vmem:[%s3521_s1 + $0x430] ss:$8 sps:$4 sm:$0xff]   ;;  %v2290_v17 = vld [vmem:[%s3521_s1 + $0x444] ss:$8 sps:$4 sm:$0xff]  }
   0x7   :  { %1629 = vmatpush1.bf16.msra.mxu1 %v2274_v6  ;;  %v2292_v18 = vld [vmem:[%s3521_s1 + $0x40] ss:$8 sps:$4 sm:$0xff]   ;;  %v2294_v20 = vld [vmem:[%s3521_s1 + $0x54] ss:$8 sps:$4 sm:$0xff]   ;;  %v2298_v22 = vld [vmem:[%s3521_s1 + $0x50] ss:$8 sps:$4 sm:$0xff]  }
   0x8   :  { %1793 = vmatpush1.bf16.msra.mxu0 %v2275_v7  ;;  %1630 = vmatprep.subr.bf16.mxu1 %v2276_v8  ;;  %v2293_v19 = vld [vmem:[%s3521_s1 + $0x440] ss:$8 sps:$4 sm:$0xff]   ;;  %v2296_v21 = vld [vmem:[%s3521_s1 + $0x454] ss:$8 sps:$4 sm:$0xff]   ;;  %v2299_v23 = vld [vmem:[%s3521_s1 + $0x450] ss:$8 sps:$4 sm:$0xff]  }
   0x9   :  { %1794 = vmatprep.subr.bf16.mxu0 %v2278_v9  ;;  %v2300_v24 = vld [vmem:[%s3521_s1 + $0x64] ss:$8 sps:$4 sm:$0xff]   ;;  %v2304_v26 = vld [vmem:[%s3521_s1 + $0x60] ss:$8 sps:$4 sm:$0xff]   ;;  %v2306_v28 = vld [vmem:[%s3521_s1 + $0x74] ss:$8 sps:$4 sm:$0xff]  }
   0xa   :  { %v2302_v25 = vld [vmem:[%s3521_s1 + $0x464] ss:$8 sps:$4 sm:$0xff]   ;;  %v2305_v27 = vld [vmem:[%s3521_s1 + $0x460] ss:$8 sps:$4 sm:$0xff]   ;;  %v2308_v29 = vld [vmem:[%s3521_s1 + $0x474] ss:$8 sps:$4 sm:$0xff]  }
   0xb   :  { %1631 = vmatpush1.bf16.msra.mxu1 %v2280_v10  ;;  %v2310_v30 = vld [vmem:[%s3521_s1 + $0x70] ss:$8 sps:$4 sm:$0xff]   ;;  %v2312_v32 = vld [vmem:[%s3521_s1 + $0x84] ss:$8 sps:$4 sm:$0xff]   ;;  %v2316_v34 = vld [vmem:[%s3521_s1 + $0x80] ss:$8 sps:$4 sm:$0xff]  }
   0xc   :  { %1795 = vmatpush1.bf16.msra.mxu0 %v2281_v11  ;;  %1632 = vmatprep.subr.bf16.mxu1 %v2282_v12  ;;  %v2311_v31 = vld [vmem:[%s3521_s1 + $0x470] ss:$8 sps:$4 sm:$0xff]   ;;  %v2314_v33 = vld [vmem:[%s3521_s1 + $0x484] ss:$8 sps:$4 sm:$0xff]   ;;  %v2317_v35 = vld [vmem:[%s3521_s1 + $0x480] ss:$8 sps:$4 sm:$0xff]  }
   0xd   :  { %1796 = vmatprep.subr.bf16.mxu0 %v2284_v13  ;;  %v2318_v36 = vld [vmem:[%s3521_s1 + $0x94] ss:$8 sps:$4 sm:$0xff]   ;;  %v2322_v38 = vld [vmem:[%s3521_s1 + $0x90] ss:$8 sps:$4 sm:$0xff]   ;;  %v2324_v40 = vld [vmem:[%s3521_s1 + $0xa4] ss:$8 sps:$4 sm:$0xff]  }
   0xe   :  { %v2320_v37 = vld [vmem:[%s3521_s1 + $0x494] ss:$8 sps:$4 sm:$0xff]   ;;  %v2323_v39 = vld [vmem:[%s3521_s1 + $0x490] ss:$8 sps:$4 sm:$0xff]   ;;  %v2326_v41 = vld [vmem:[%s3521_s1 + $0x4a4] ss:$8 sps:$4 sm:$0xff]  }
   0xf   :  { %1633 = vmatpush1.bf16.msra.mxu1 %v2286_v14  ;;  %v2328_v42 = vld [vmem:[%s3521_s1 + $0xa0] ss:$8 sps:$4 sm:$0xff]   ;;  %v2330_v44 = vld [vmem:[%s3521_s1 + $0xb4] ss:$8 sps:$4 sm:$0xff]   ;;  %v2334_v47 = vld [vmem:[%s3521_s1 + $0xb0] ss:$8 sps:$4 sm:$0xff]  }
  0x10   :  { %1797 = vmatpush1.bf16.msra.mxu0 %v2287_v15  ;;  %1634 = vmatprep.subr.bf16.mxu1 %v2288_v16  ;;  %v2329_v43 = vld [vmem:[%s3521_s1 + $0x4a0] ss:$8 sps:$4 sm:$0xff]   ;;  %v2332_v45 = vld [vmem:[%s3521_s1 + $0x4b4] ss:$8 sps:$4 sm:$0xff]   ;;  %v2335_v49 = vld [vmem:[%s3521_s1 + $0x4b0] ss:$8 sps:$4 sm:$0xff]  }
  0x11   :  { %1798 = vmatprep.subr.bf16.mxu0 %v2290_v17  ;;  %v14_v46 = vld [vmem:[%s3522_s0] sm:$0xff]  ;;  %v2342_v56 = vld [vmem:[%s3521_s1 + $0xd4] ss:$8 sps:$4 sm:$0xff]   ;;  %v2346_v58 = vld [vmem:[%s3521_s1 + $0xd0] ss:$8 sps:$4 sm:$0xff]  }
  0x12   :  { %v1965_v48 = vcombine.high %v14_v46, %v14_v46  ;;  %v18_v50 = vld [vmem:[%s3522_s0 + $0x20] sm:$0xff]  ;;  %v2344_v57 = vld [vmem:[%s3521_s1 + $0x4d4] ss:$8 sps:$4 sm:$0xff]   ;;  %v2347_v59 = vld [vmem:[%s3521_s1 + $0x4d0] ss:$8 sps:$4 sm:$0xff]   ;;  %v1964_v6 = vcombine.low %v14_v46, %v14_v46 }
  0x13   :  { %1635 = vmatpush1.bf16.msra.mxu1 %v2292_v18  ;;  %v2336_v51 = vld [vmem:[%s3521_s1 + $0xc4] ss:$8 sps:$4 sm:$0xff]   ;;  %v1973_v53 = vcombine.high %v18_v50, %v18_v50  ;;  %v2340_v54 = vld [vmem:[%s3521_s1 + $0xc0] ss:$8 sps:$4 sm:$0xff]   ;;  %v2354_v0 = vld [vmem:[%s3521_s1 + $0xf4] ss:$8 sps:$4 sm:$0xff]   ;;  %v1972_v7 = vcombine.low %v18_v50, %v18_v50 }
  0x14   :  { %1799 = vmatpush1.bf16.msra.mxu0 %v2293_v19  ;;  %1636 = vmatprep.subr.bf16.mxu1 %v2294_v20  ;;  %v2338_v52 = vld [vmem:[%s3521_s1 + $0x4c4] ss:$8 sps:$4 sm:$0xff]   ;;  %v2341_v55 = vld [vmem:[%s3521_s1 + $0x4c0] ss:$8 sps:$4 sm:$0xff]   ;;  %v2356_v1 = vld [vmem:[%s3521_s1 + $0x4f4] ss:$8 sps:$4 sm:$0xff]  }
  0x15   :  { %1800 = vmatprep.subr.bf16.mxu0 %v2296_v21  ;;  %1658 = vmatprep.mubr.bf16.mxu1 %v1965_v48  ;;  %v2348_v60 = vld [vmem:[%s3521_s1 + $0xe4] ss:$8 sps:$4 sm:$0xff]   ;;  %v2352_v62 = vld [vmem:[%s3521_s1 + $0xe0] ss:$8 sps:$4 sm:$0xff]   ;;  %v2358_v2 = vld [vmem:[%s3521_s1 + $0xf0] ss:$8 sps:$4 sm:$0xff]  }
  0x16   :  { %1822 = vmatprep.mubr.bf16.mxu0 %v1973_v53  ;;  %v2350_v61 = vld [vmem:[%s3521_s1 + $0x4e4] ss:$8 sps:$4 sm:$0xff]   ;;  %v2353_v63 = vld [vmem:[%s3521_s1 + $0x4e0] ss:$8 sps:$4 sm:$0xff]   ;;  %v2359_v3 = vld [vmem:[%s3521_s1 + $0x4f0] ss:$8 sps:$4 sm:$0xff]  }
  0x17   :  { %1637 = vmatpush1.bf16.msra.mxu1 %v2298_v22  ;;  %v2364_v4 = vld [vmem:[%s3521_s1 + $0x104] ss:$8 sps:$4 sm:$0xff]   ;;  %v2362_v8 = vld [vmem:[%s3521_s1 + $0x100] ss:$8 sps:$4 sm:$0xff]   ;;  %v2372_v10 = vld [vmem:[%s3521_s1 + $0x114] ss:$8 sps:$4 sm:$0xff]  }
  0x18   :  { %1801 = vmatpush1.bf16.msra.mxu0 %v2299_v23  ;;  %1638 = vmatprep.subr.bf16.mxu1 %v2300_v24  ;;  %v2369_v5 = vld [vmem:[%s3521_s1 + $0x504] ss:$8 sps:$4 sm:$0xff]   ;;  %v2367_v9 = vld [vmem:[%s3521_s1 + $0x500] ss:$8 sps:$4 sm:$0xff]   ;;  %v2375_v11 = vld [vmem:[%s3521_s1 + $0x514] ss:$8 sps:$4 sm:$0xff]  }
  0x19   :  { %1802 = vmatprep.subr.bf16.mxu0 %v2302_v25  ;;  %v2370_v12 = vld [vmem:[%s3521_s1 + $0x110] ss:$8 sps:$4 sm:$0xff]   ;;  %v2378_v14 = vld [vmem:[%s3521_s1 + $0x124] ss:$8 sps:$4 sm:$0xff]   ;;  %v2376_v16 = vld [vmem:[%s3521_s1 + $0x120] ss:$8 sps:$4 sm:$0xff]  }
  0x1a   :  { %v2373_v13 = vld [vmem:[%s3521_s1 + $0x510] ss:$8 sps:$4 sm:$0xff]   ;;  %v2381_v15 = vld [vmem:[%s3521_s1 + $0x524] ss:$8 sps:$4 sm:$0xff]   ;;  %v2379_v17 = vld [vmem:[%s3521_s1 + $0x520] ss:$8 sps:$4 sm:$0xff]  }
  0x1b   :  { %1639 = vmatpush1.bf16.msra.mxu1 %v2304_v26  ;;  %v2384_v18 = vld [vmem:[%s3521_s1 + $0x134] ss:$8 sps:$4 sm:$0xff]   ;;  %v2382_v20 = vld [vmem:[%s3521_s1 + $0x130] ss:$8 sps:$4 sm:$0xff]   ;;  %v2390_v22 = vld [vmem:[%s3521_s1 + $0x144] ss:$8 sps:$4 sm:$0xff]  }
  0x1c   :  { %1803 = vmatpush1.bf16.msra.mxu0 %v2305_v27  ;;  %1640 = vmatprep.subr.bf16.mxu1 %v2306_v28  ;;  %v2387_v19 = vld [vmem:[%s3521_s1 + $0x534] ss:$8 sps:$4 sm:$0xff]   ;;  %v2385_v21 = vld [vmem:[%s3521_s1 + $0x530] ss:$8 sps:$4 sm:$0xff]   ;;  %v2393_v23 = vld [vmem:[%s3521_s1 + $0x544] ss:$8 sps:$4 sm:$0xff]  }
  0x1d   :  { %1804 = vmatprep.subr.bf16.mxu0 %v2308_v29  ;;  %v2388_v24 = vld [vmem:[%s3521_s1 + $0x140] ss:$8 sps:$4 sm:$0xff]   ;;  %v2396_v26 = vld [vmem:[%s3521_s1 + $0x154] ss:$8 sps:$4 sm:$0xff]   ;;  %v2394_v28 = vld [vmem:[%s3521_s1 + $0x150] ss:$8 sps:$4 sm:$0xff]  }
  0x1e   :  { %v2391_v25 = vld [vmem:[%s3521_s1 + $0x540] ss:$8 sps:$4 sm:$0xff]   ;;  %v2399_v27 = vld [vmem:[%s3521_s1 + $0x554] ss:$8 sps:$4 sm:$0xff]   ;;  %v2397_v29 = vld [vmem:[%s3521_s1 + $0x550] ss:$8 sps:$4 sm:$0xff]  }
  0x1f   :  { %1641 = vmatpush1.bf16.msra.mxu1 %v2310_v30  ;;  %v2402_v30 = vld [vmem:[%s3521_s1 + $0x164] ss:$8 sps:$4 sm:$0xff]   ;;  %v2420_v46 = vld [vmem:[%s3521_s1 + $0x194] ss:$8 sps:$4 sm:$0xff]   ;;  %v2418_v48 = vld [vmem:[%s3521_s1 + $0x190] ss:$8 sps:$4 sm:$0xff]  }
  0x20   :  { %1805 = vmatpush1.bf16.msra.mxu0 %v2311_v31  ;;  %1642 = vmatprep.subr.bf16.mxu1 %v2312_v32  ;;  %v2405_v31 = vld [vmem:[%s3521_s1 + $0x564] ss:$8 sps:$4 sm:$0xff]   ;;  %v2427_v53 = vld [vmem:[%s3521_s1 + $0x5a0] ss:$8 sps:$4 sm:$0xff]  }
  0x21   :  { %1806 = vmatprep.subr.bf16.mxu0 %v2314_v33  ;;  %v2963_v32 = vld [vmem:[%s3522_s0 + $0x8] sm:$0xff] }
  0x22   :  { %v2400_v33 = vld [vmem:[%s3521_s1 + $0x160] ss:$8 sps:$4 sm:$0xff]   ;;  %v2426_v50 = vld [vmem:[%s3521_s1 + $0x1a4] ss:$8 sps:$4 sm:$0xff]  }
  0x23   :  { %1643 = vmatpush1.bf16.msra.mxu1 %v2316_v34  ;;  %v2403_v34 = vld [vmem:[%s3521_s1 + $0x560] ss:$8 sps:$4 sm:$0xff]  }
  0x24   :  { %1807 = vmatpush1.bf16.msra.mxu0 %v2317_v35  ;;  %1644 = vmatprep.subr.bf16.mxu1 %v2318_v36  ;;  %v1967_v35 = vcombine.high %v2963_v32, %v2963_v32  ;;  %v2976_v36 = vld [vmem:[%s3522_s0 + $0x28] sm:$0xff] }
  0x25   :  { %1808 = vmatprep.subr.bf16.mxu0 %v2320_v37  ;;  %v2408_v37 = vld [vmem:[%s3521_s1 + $0x174] ss:$8 sps:$4 sm:$0xff]  }
  0x27   :  { %1645 = vmatpush1.bf16.msra.mxu1 %v2322_v38  ;;  %v1975_v38 = vcombine.high %v2976_v36, %v2976_v36 }
  0x28   :  { %1809 = vmatpush1.bf16.msra.mxu0 %v2323_v39  ;;  %1646 = vmatprep.subr.bf16.mxu1 %v2324_v40  ;;  %v2411_v39 = vld [vmem:[%s3521_s1 + $0x574] ss:$8 sps:$4 sm:$0xff]   ;;  %v2406_v40 = vld [vmem:[%s3521_s1 + $0x170] ss:$8 sps:$4 sm:$0xff]  }
  0x29   :  { %1810 = vmatprep.subr.bf16.mxu0 %v2326_v41  ;;  %v2409_v41 = vld [vmem:[%s3521_s1 + $0x570] ss:$8 sps:$4 sm:$0xff]  }
  0x2b   :  { %1647 = vmatpush1.bf16.msra.mxu1 %v2328_v42  ;;  %v2414_v42 = vld [vmem:[%s3521_s1 + $0x184] ss:$8 sps:$4 sm:$0xff]  }
  0x2c   :  { %1811 = vmatpush1.bf16.msra.mxu0 %v2329_v43  ;;  %1648 = vmatprep.subr.bf16.mxu1 %v2330_v44  ;;  %v2417_v43 = vld [vmem:[%s3521_s1 + $0x584] ss:$8 sps:$4 sm:$0xff]   ;;  %v2412_v44 = vld [vmem:[%s3521_s1 + $0x180] ss:$8 sps:$4 sm:$0xff]  }
  0x2d   :  { %1812 = vmatprep.subr.bf16.mxu0 %v2332_v45  ;;  %v2415_v45 = vld [vmem:[%s3521_s1 + $0x580] ss:$8 sps:$4 sm:$0xff]  }
  0x2f   :  { %1649 = vmatpush1.bf16.msra.mxu1 %v2334_v47  ;;  %v2423_v47 = vld [vmem:[%s3521_s1 + $0x594] ss:$8 sps:$4 sm:$0xff]  }
  0x30   :  { %1813 = vmatpush1.bf16.msra.mxu0 %v2335_v49  ;;  %1650 = vmatprep.subr.bf16.mxu1 %v2336_v51  ;;  %v2421_v49 = vld [vmem:[%s3521_s1 + $0x590] ss:$8 sps:$4 sm:$0xff]   ;;  %v2429_v51 = vld [vmem:[%s3521_s1 + $0x5a4] ss:$8 sps:$4 sm:$0xff]  }
  0x31   :  { %1814 = vmatprep.subr.bf16.mxu0 %v2338_v52  ;;  %v2424_v52 = vld [vmem:[%s3521_s1 + $0x1a0] ss:$8 sps:$4 sm:$0xff]  }
  0x33   :  { %1651 = vmatpush1.bf16.msra.mxu1 %v2340_v54  ;;  %v2432_v54 = vld [vmem:[%s3521_s1 + $0x1b4] ss:$8 sps:$4 sm:$0xff]  }
  0x34   :  { %1815 = vmatpush1.bf16.msra.mxu0 %v2341_v55  ;;  %1652 = vmatprep.subr.bf16.mxu1 %v2342_v56  ;;  %v2435_v55 = vld [vmem:[%s3521_s1 + $0x5b4] ss:$8 sps:$4 sm:$0xff]   ;;  %v2430_v56 = vld [vmem:[%s3521_s1 + $0x1b0] ss:$8 sps:$4 sm:$0xff]  }
  0x35   :  { %1816 = vmatprep.subr.bf16.mxu0 %v2344_v57  ;;  %v2433_v57 = vld [vmem:[%s3521_s1 + $0x5b0] ss:$8 sps:$4 sm:$0xff]  }
  0x37   :  { %1653 = vmatpush1.bf16.msra.mxu1 %v2346_v58  ;;  %v2438_v58 = vld [vmem:[%s3521_s1 + $0x1c4] ss:$8 sps:$4 sm:$0xff]  }
  0x38   :  { %1817 = vmatpush1.bf16.msra.mxu0 %v2347_v59  ;;  %1654 = vmatprep.subr.bf16.mxu1 %v2348_v60  ;;  %v2441_v59 = vld [vmem:[%s3521_s1 + $0x5c4] ss:$8 sps:$4 sm:$0xff]   ;;  %v2436_v60 = vld [vmem:[%s3521_s1 + $0x1c0] ss:$8 sps:$4 sm:$0xff]  }
  0x39   :  { %1818 = vmatprep.subr.bf16.mxu0 %v2350_v61  ;;  %v2439_v61 = vld [vmem:[%s3521_s1 + $0x5c0] ss:$8 sps:$4 sm:$0xff]  }
  0x3b   :  { %1655 = vmatpush1.bf16.msra.mxu1 %v2352_v62  ;;  %v2444_v62 = vld [vmem:[%s3521_s1 + $0x1d4] ss:$8 sps:$4 sm:$0xff]  }
  0x3c   :  { %1819 = vmatpush1.bf16.msra.mxu0 %v2353_v63  ;;  %1656 = vmatprep.subr.bf16.mxu1 %v2354_v0  ;;  %v2447_v63 = vld [vmem:[%s3521_s1 + $0x5d4] ss:$8 sps:$4 sm:$0xff]   ;;  %v2442_v0 = vld [vmem:[%s3521_s1 + $0x1d0] ss:$8 sps:$4 sm:$0xff]  }
  0x3d   :  { %1820 = vmatprep.subr.bf16.mxu0 %v2356_v1  ;;  %v2445_v1 = vld [vmem:[%s3521_s1 + $0x5d0] ss:$8 sps:$4 sm:$0xff]  }
  0x3f   :  { %1657 = vmatpush1.bf16.msra.mxu1 %v2358_v2  ;;  %v2450_v2 = vld [vmem:[%s3521_s1 + $0x1e4] ss:$8 sps:$4 sm:$0xff]  }
  0x40   :  { %1821 = vmatpush1.bf16.msra.mxu0 %v2359_v3  ;;  %1667 = vmatprep.subr.bf16.mxu1 %v2364_v4  ;;  %v2453_v3 = vld [vmem:[%s3521_s1 + $0x5e4] ss:$8 sps:$4 sm:$0xff]   ;;  %v2448_v4 = vld [vmem:[%s3521_s1 + $0x1e0] ss:$8 sps:$4 sm:$0xff]  }
  0x41   :  { %1831 = vmatprep.subr.bf16.mxu0 %v2369_v5  ;;  %v2451_v5 = vld [vmem:[%s3521_s1 + $0x5e0] ss:$8 sps:$4 sm:$0xff]  }
  0x42   :  { %1659 = vmatmul.mubr.bf16.vlgmr.msra.gmra.mrb[0].mxu1 %v1964_v6  ;;  %v2456_v6 = vld [vmem:[%s3521_s1 + $0x1f4] ss:$8 sps:$4 sm:$0xff]  }
  0x43   :  { %1823 = vmatmul.mubr.bf16.vlgmr.msra.gmra.mrb[0].mxu0 %v1972_v7  ;;  %1668 = vmatpush1.bf16.msra.mxu1 %v2362_v8  ;;  %v2459_v7 = vld [vmem:[%s3521_s1 + $0x5f4] ss:$8 sps:$4 sm:$0xff]   ;;  %v2454_v8 = vld [vmem:[%s3521_s1 + $0x1f0] ss:$8 sps:$4 sm:$0xff]  }
  0x44   :  { %1832 = vmatpush1.bf16.msra.mxu0 %v2367_v9  ;;  %1669 = vmatprep.subr.bf16.mxu1 %v2372_v10  ;;  %v2457_v9 = vld [vmem:[%s3521_s1 + $0x5f0] ss:$8 sps:$4 sm:$0xff]   ;;  %v2464_v10 = vld [vmem:[%s3521_s1 + $0x204] ss:$8 sps:$4 sm:$0xff]  }
  0x45   :  { %1833 = vmatprep.subr.bf16.mxu0 %v2375_v11  ;;  %1699 = vmatprep.mubr.bf16.mxu1 %v1967_v35  ;;  %v2469_v11 = vld [vmem:[%s3521_s1 + $0x604] ss:$8 sps:$4 sm:$0xff]   ;;  %v2491_v35 = vld [vmem:[%s3521_s1 + $0x640] ss:$8 sps:$4 sm:$0xff]  }
  0x46   :  { %1863 = vmatprep.mubr.bf16.mxu0 %v1975_v38  ;;  %v2494_v38 = vld [vmem:[%s3521_s1 + $0x250] ss:$8 sps:$4 sm:$0xff]  }
  0x47   :  { %1670 = vmatpush1.bf16.msra.mxu1 %v2370_v12  ;;  %v1966_v12 = vcombine.low %v2963_v32, %v2963_v32  ;;  %v2490_v32 = vld [vmem:[%s3521_s1 + $0x244] ss:$8 sps:$4 sm:$0xff]  }
  0x48   :  { %1834 = vmatpush1.bf16.msra.mxu0 %v2373_v13  ;;  %1671 = vmatprep.subr.bf16.mxu1 %v2378_v14  ;;  %v2462_v13 = vld [vmem:[%s3521_s1 + $0x200] ss:$8 sps:$4 sm:$0xff]   ;;  %v1974_v14 = vcombine.low %v2976_v36, %v2976_v36  ;;  %v2496_v36 = vld [vmem:[%s3521_s1 + $0x254] ss:$8 sps:$4 sm:$0xff]  }
  0x49   :  { %1835 = vmatprep.subr.bf16.mxu0 %v2381_v15  ;;  %v2467_v15 = vld [vmem:[%s3521_s1 + $0x600] ss:$8 sps:$4 sm:$0xff]  }
  0x4b   :  { %1672 = vmatpush1.bf16.msra.mxu1 %v2376_v16  ;;  %v2472_v16 = vld [vmem:[%s3521_s1 + $0x214] ss:$8 sps:$4 sm:$0xff]  }
  0x4c   :  { %1836 = vmatpush1.bf16.msra.mxu0 %v2379_v17  ;;  %1673 = vmatprep.subr.bf16.mxu1 %v2384_v18  ;;  %v2475_v17 = vld [vmem:[%s3521_s1 + $0x614] ss:$8 sps:$4 sm:$0xff]  }
  0x4d   :  { %1837 = vmatprep.subr.bf16.mxu0 %v2387_v19  ;;  %v3113_v18 = vld [vmem:[%s3522_s0 + $0x10] sm:$0xff] }
  0x4e   :  { %v1969_v19 = vcombine.high %v3113_v18, %v3113_v18 }
  0x4f   :  { %1674 = vmatpush1.bf16.msra.mxu1 %v2382_v20  ;;  %v3120_v20 = vld [vmem:[%s3522_s0 + $0x30] sm:$0xff] }
  0x50   :  { %1838 = vmatpush1.bf16.msra.mxu0 %v2385_v21  ;;  %1675 = vmatprep.subr.bf16.mxu1 %v2390_v22  ;;  %v2470_v21 = vld [vmem:[%s3521_s1 + $0x210] ss:$8 sps:$4 sm:$0xff]  }
  0x51   :  { %1839 = vmatprep.subr.bf16.mxu0 %v2393_v23  ;;  %v2473_v22 = vld [vmem:[%s3521_s1 + $0x610] ss:$8 sps:$4 sm:$0xff]   ;;  %v1977_v23 = vcombine.high %v3120_v20, %v3120_v20 }
  0x53   :  { %1676 = vmatpush1.bf16.msra.mxu1 %v2388_v24  ;;  %v2478_v24 = vld [vmem:[%s3521_s1 + $0x224] ss:$8 sps:$4 sm:$0xff]  }
  0x54   :  { %1840 = vmatpush1.bf16.msra.mxu0 %v2391_v25  ;;  %1677 = vmatprep.subr.bf16.mxu1 %v2396_v26  ;;  %v2481_v25 = vld [vmem:[%s3521_s1 + $0x624] ss:$8 sps:$4 sm:$0xff]   ;;  %v2476_v26 = vld [vmem:[%s3521_s1 + $0x220] ss:$8 sps:$4 sm:$0xff]  }
  0x55   :  { %1841 = vmatprep.subr.bf16.mxu0 %v2399_v27  ;;  %v2479_v27 = vld [vmem:[%s3521_s1 + $0x620] ss:$8 sps:$4 sm:$0xff]  }
  0x57   :  { %1678 = vmatpush1.bf16.msra.mxu1 %v2394_v28  ;;  %v2484_v28 = vld [vmem:[%s3521_s1 + $0x234] ss:$8 sps:$4 sm:$0xff]  }
  0x58   :  { %1842 = vmatpush1.bf16.msra.mxu0 %v2397_v29  ;;  %1679 = vmatprep.subr.bf16.mxu1 %v2402_v30  ;;  %v2487_v29 = vld [vmem:[%s3521_s1 + $0x634] ss:$8 sps:$4 sm:$0xff]   ;;  %v2482_v30 = vld [vmem:[%s3521_s1 + $0x230] ss:$8 sps:$4 sm:$0xff]  }
  0x59   :  { %1843 = vmatprep.subr.bf16.mxu0 %v2405_v31  ;;  %v2485_v31 = vld [vmem:[%s3521_s1 + $0x630] ss:$8 sps:$4 sm:$0xff]  }
  0x5b   :  { %1680 = vmatpush1.bf16.msra.mxu1 %v2400_v33  ;;  %v2493_v33 = vld [vmem:[%s3521_s1 + $0x644] ss:$8 sps:$4 sm:$0xff]  }
  0x5c   :  { %1844 = vmatpush1.bf16.msra.mxu0 %v2403_v34  ;;  %1681 = vmatprep.subr.bf16.mxu1 %v2408_v37  ;;  %v2488_v34 = vld [vmem:[%s3521_s1 + $0x240] ss:$8 sps:$4 sm:$0xff]   ;;  %v2499_v37 = vld [vmem:[%s3521_s1 + $0x654] ss:$8 sps:$4 sm:$0xff]  }
  0x5d   :  { %1845 = vmatprep.subr.bf16.mxu0 %v2411_v39  ;;  %v2497_v39 = vld [vmem:[%s3521_s1 + $0x650] ss:$8 sps:$4 sm:$0xff]  }
  0x5f   :  { %1682 = vmatpush1.bf16.msra.mxu1 %v2406_v40  ;;  %v2502_v40 = vld [vmem:[%s3521_s1 + $0x264] ss:$8 sps:$4 sm:$0xff]  }
  0x60   :  { %1846 = vmatpush1.bf16.msra.mxu0 %v2409_v41  ;;  %1683 = vmatprep.subr.bf16.mxu1 %v2414_v42  ;;  %v2505_v41 = vld [vmem:[%s3521_s1 + $0x664] ss:$8 sps:$4 sm:$0xff]   ;;  %v2500_v42 = vld [vmem:[%s3521_s1 + $0x260] ss:$8 sps:$4 sm:$0xff]  }
  0x61   :  { %1847 = vmatprep.subr.bf16.mxu0 %v2417_v43  ;;  %v2503_v43 = vld [vmem:[%s3521_s1 + $0x660] ss:$8 sps:$4 sm:$0xff]  }
  0x63   :  { %1684 = vmatpush1.bf16.msra.mxu1 %v2412_v44  ;;  %v2508_v44 = vld [vmem:[%s3521_s1 + $0x274] ss:$8 sps:$4 sm:$0xff]  }
  0x64   :  { %1848 = vmatpush1.bf16.msra.mxu0 %v2415_v45  ;;  %1685 = vmatprep.subr.bf16.mxu1 %v2420_v46  ;;  %v2511_v45 = vld [vmem:[%s3521_s1 + $0x674] ss:$8 sps:$4 sm:$0xff]   ;;  %v2506_v46 = vld [vmem:[%s3521_s1 + $0x270] ss:$8 sps:$4 sm:$0xff]  }
  0x65   :  { %1849 = vmatprep.subr.bf16.mxu0 %v2423_v47  ;;  %v2509_v47 = vld [vmem:[%s3521_s1 + $0x670] ss:$8 sps:$4 sm:$0xff]  }
  0x67   :  { %1686 = vmatpush1.bf16.msra.mxu1 %v2418_v48  ;;  %v2514_v48 = vld [vmem:[%s3521_s1 + $0x284] ss:$8 sps:$4 sm:$0xff]  }
  0x68   :  { %1850 = vmatpush1.bf16.msra.mxu0 %v2421_v49  ;;  %1687 = vmatprep.subr.bf16.mxu1 %v2426_v50  ;;  %v2517_v49 = vld [vmem:[%s3521_s1 + $0x684] ss:$8 sps:$4 sm:$0xff]   ;;  %v2512_v50 = vld [vmem:[%s3521_s1 + $0x280] ss:$8 sps:$4 sm:$0xff]  }
  0x69   :  { %1851 = vmatprep.subr.bf16.mxu0 %v2429_v51  ;;  %v2515_v51 = vld [vmem:[%s3521_s1 + $0x680] ss:$8 sps:$4 sm:$0xff]  }
  0x6b   :  { %1688 = vmatpush1.bf16.msra.mxu1 %v2424_v52  ;;  %v2520_v52 = vld [vmem:[%s3521_s1 + $0x294] ss:$8 sps:$4 sm:$0xff]  }
  0x6c   :  { %1852 = vmatpush1.bf16.msra.mxu0 %v2427_v53  ;;  %1689 = vmatprep.subr.bf16.mxu1 %v2432_v54  ;;  %v2523_v53 = vld [vmem:[%s3521_s1 + $0x694] ss:$8 sps:$4 sm:$0xff]   ;;  %v2518_v54 = vld [vmem:[%s3521_s1 + $0x290] ss:$8 sps:$4 sm:$0xff]  }
  0x6d   :  { %1853 = vmatprep.subr.bf16.mxu0 %v2435_v55  ;;  %v2521_v55 = vld [vmem:[%s3521_s1 + $0x690] ss:$8 sps:$4 sm:$0xff]  }
  0x6f   :  { %1690 = vmatpush1.bf16.msra.mxu1 %v2430_v56  ;;  %v2526_v56 = vld [vmem:[%s3521_s1 + $0x2a4] ss:$8 sps:$4 sm:$0xff]  }
  0x70   :  { %1854 = vmatpush1.bf16.msra.mxu0 %v2433_v57  ;;  %1691 = vmatprep.subr.bf16.mxu1 %v2438_v58  ;;  %v2529_v57 = vld [vmem:[%s3521_s1 + $0x6a4] ss:$8 sps:$4 sm:$0xff]   ;;  %v2524_v58 = vld [vmem:[%s3521_s1 + $0x2a0] ss:$8 sps:$4 sm:$0xff]  }
  0x71   :  { %1855 = vmatprep.subr.bf16.mxu0 %v2441_v59  ;;  %v2527_v59 = vld [vmem:[%s3521_s1 + $0x6a0] ss:$8 sps:$4 sm:$0xff]  }
  0x73   :  { %1692 = vmatpush1.bf16.msra.mxu1 %v2436_v60  ;;  %v2532_v60 = vld [vmem:[%s3521_s1 + $0x2b4] ss:$8 sps:$4 sm:$0xff]  }
  0x74   :  { %1856 = vmatpush1.bf16.msra.mxu0 %v2439_v61  ;;  %1693 = vmatprep.subr.bf16.mxu1 %v2444_v62  ;;  %v2535_v61 = vld [vmem:[%s3521_s1 + $0x6b4] ss:$8 sps:$4 sm:$0xff]   ;;  %v2530_v62 = vld [vmem:[%s3521_s1 + $0x2b0] ss:$8 sps:$4 sm:$0xff]  }
  0x75   :  { %1857 = vmatprep.subr.bf16.mxu0 %v2447_v63  ;;  %v2533_v63 = vld [vmem:[%s3521_s1 + $0x6b0] ss:$8 sps:$4 sm:$0xff]  }
  0x77   :  { %1694 = vmatpush1.bf16.msra.mxu1 %v2442_v0  ;;  %v2538_v0 = vld [vmem:[%s3521_s1 + $0x2c4] ss:$8 sps:$4 sm:$0xff]  }
  0x78   :  { %1858 = vmatpush1.bf16.msra.mxu0 %v2445_v1  ;;  %1695 = vmatprep.subr.bf16.mxu1 %v2450_v2  ;;  %v2541_v1 = vld [vmem:[%s3521_s1 + $0x6c4] ss:$8 sps:$4 sm:$0xff]   ;;  %v2536_v2 = vld [vmem:[%s3521_s1 + $0x2c0] ss:$8 sps:$4 sm:$0xff]  }
  0x79   :  { %1859 = vmatprep.subr.bf16.mxu0 %v2453_v3  ;;  %v2539_v3 = vld [vmem:[%s3521_s1 + $0x6c0] ss:$8 sps:$4 sm:$0xff]  }
  0x7b   :  { %1696 = vmatpush1.bf16.msra.mxu1 %v2448_v4  ;;  %v2544_v4 = vld [vmem:[%s3521_s1 + $0x2d4] ss:$8 sps:$4 sm:$0xff]  }
  0x7c   :  { %1860 = vmatpush1.bf16.msra.mxu0 %v2451_v5  ;;  %1697 = vmatprep.subr.bf16.mxu1 %v2456_v6  ;;  %v2547_v5 = vld [vmem:[%s3521_s1 + $0x6d4] ss:$8 sps:$4 sm:$0xff]   ;;  %v2542_v6 = vld [vmem:[%s3521_s1 + $0x2d0] ss:$8 sps:$4 sm:$0xff]  }
  0x7d   :  { %1861 = vmatprep.subr.bf16.mxu0 %v2459_v7  ;;  %v2545_v7 = vld [vmem:[%s3521_s1 + $0x6d0] ss:$8 sps:$4 sm:$0xff]  }
  0x7f   :  { %1698 = vmatpush1.bf16.msra.mxu1 %v2454_v8  ;;  %v2550_v8 = vld [vmem:[%s3521_s1 + $0x2e4] ss:$8 sps:$4 sm:$0xff]  }
  0x80   :  { %1862 = vmatpush1.bf16.msra.mxu0 %v2457_v9  ;;  %1708 = vmatprep.subr.bf16.mxu1 %v2464_v10  ;;  %v2553_v9 = vld [vmem:[%s3521_s1 + $0x6e4] ss:$8 sps:$4 sm:$0xff]   ;;  %v2548_v10 = vld [vmem:[%s3521_s1 + $0x2e0] ss:$8 sps:$4 sm:$0xff]  }
  0x81   :  { %1872 = vmatprep.subr.bf16.mxu0 %v2469_v11  ;;  %v2551_v11 = vld [vmem:[%s3521_s1 + $0x6e0] ss:$8 sps:$4 sm:$0xff]  }
  0x82   :  { %1700 = vmatmul.mubr.bf16.vlgmr.msra.gmra.mrb[0].mxu1 %v1966_v12  ;;  %v2556_v12 = vld [vmem:[%s3521_s1 + $0x2f4] ss:$8 sps:$4 sm:$0xff]  }
  0x83   :  { %1864 = vmatmul.mubr.bf16.vlgmr.msra.gmra.mrb[0].mxu0 %v1974_v14  ;;  %1709 = vmatpush1.bf16.msra.mxu1 %v2462_v13  ;;  %v2559_v13 = vld [vmem:[%s3521_s1 + $0x6f4] ss:$8 sps:$4 sm:$0xff]   ;;  %v2554_v14 = vld [vmem:[%s3521_s1 + $0x2f0] ss:$8 sps:$4 sm:$0xff]  }
  0x84   :  { %1873 = vmatpush1.bf16.msra.mxu0 %v2467_v15  ;;  %1710 = vmatprep.subr.bf16.mxu1 %v2472_v16  ;;  %v2557_v15 = vld [vmem:[%s3521_s1 + $0x6f0] ss:$8 sps:$4 sm:$0xff]   ;;  %v2564_v16 = vld [vmem:[%s3521_s1 + $0x304] ss:$8 sps:$4 sm:$0xff]  }
  0x85   :  { %1874 = vmatprep.subr.bf16.mxu0 %v2475_v17  ;;  %1740 = vmatprep.mubr.bf16.mxu1 %v1969_v19  ;;  %v2569_v17 = vld [vmem:[%s3521_s1 + $0x704] ss:$8 sps:$4 sm:$0xff]   ;;  %v1968_v19 = vcombine.low %v3113_v18, %v3113_v18  ;;  %v2567_v18 = vld [vmem:[%s3521_s1 + $0x700] ss:$8 sps:$4 sm:$0xff]  }
  0x86   :  { %1904 = vmatprep.mubr.bf16.mxu0 %v1977_v23  ;;  %v3316_v23 = vld [vmem:[%s3522_s0 + $0x38] sm:$0xff] }
  0x87   :  { %1711 = vmatpush1.bf16.msra.mxu1 %v2470_v21  ;;  %v1976_v21 = vcombine.low %v3120_v20, %v3120_v20  ;;  %v2572_v20 = vld [vmem:[%s3521_s1 + $0x314] ss:$8 sps:$4 sm:$0xff]  }
  0x88   :  { %1875 = vmatpush1.bf16.msra.mxu0 %v2473_v22  ;;  %1712 = vmatprep.subr.bf16.mxu1 %v2478_v24  ;;  %v3311_v22 = vld [vmem:[%s3522_s0 + $0x18] sm:$0xff]  ;;  %v2562_v24 = vld [vmem:[%s3521_s1 + $0x300] ss:$8 sps:$4 sm:$0xff]  }
  0x89   :  { %1876 = vmatprep.subr.bf16.mxu0 %v2481_v25  ;;  %v2575_v25 = vld [vmem:[%s3521_s1 + $0x714] ss:$8 sps:$4 sm:$0xff]  }
  0x8b   :  { %1713 = vmatpush1.bf16.msra.mxu1 %v2476_v26  ;;  %v1971_v26 = vcombine.high %v3311_v22, %v3311_v22 }
  0x8c   :  { %1877 = vmatpush1.bf16.msra.mxu0 %v2479_v27  ;;  %1714 = vmatprep.subr.bf16.mxu1 %v2484_v28  ;;  %v1979_v27 = vcombine.high %v3316_v23, %v3316_v23  ;;  %v2570_v28 = vld [vmem:[%s3521_s1 + $0x310] ss:$8 sps:$4 sm:$0xff]  }
  0x8d   :  { %1878 = vmatprep.subr.bf16.mxu0 %v2487_v29  ;;  %v2573_v29 = vld [vmem:[%s3521_s1 + $0x710] ss:$8 sps:$4 sm:$0xff]  }
  0x8f   :  { %1715 = vmatpush1.bf16.msra.mxu1 %v2482_v30  ;;  %v2578_v30 = vld [vmem:[%s3521_s1 + $0x324] ss:$8 sps:$4 sm:$0xff]  }
  0x90   :  { %1879 = vmatpush1.bf16.msra.mxu0 %v2485_v31  ;;  %1716 = vmatprep.subr.bf16.mxu1 %v2490_v32  ;;  %v2581_v31 = vld [vmem:[%s3521_s1 + $0x724] ss:$8 sps:$4 sm:$0xff]   ;;  %v2576_v32 = vld [vmem:[%s3521_s1 + $0x320] ss:$8 sps:$4 sm:$0xff]  }
  0x91   :  { %1880 = vmatprep.subr.bf16.mxu0 %v2493_v33  ;;  %v2579_v33 = vld [vmem:[%s3521_s1 + $0x720] ss:$8 sps:$4 sm:$0xff]  }
  0x93   :  { %1717 = vmatpush1.bf16.msra.mxu1 %v2488_v34  ;;  %v2584_v34 = vld [vmem:[%s3521_s1 + $0x334] ss:$8 sps:$4 sm:$0xff]  }
  0x94   :  { %1881 = vmatpush1.bf16.msra.mxu0 %v2491_v35  ;;  %1718 = vmatprep.subr.bf16.mxu1 %v2496_v36  ;;  %v2587_v35 = vld [vmem:[%s3521_s1 + $0x734] ss:$8 sps:$4 sm:$0xff]   ;;  %v2582_v36 = vld [vmem:[%s3521_s1 + $0x330] ss:$8 sps:$4 sm:$0xff]  }
  0x95   :  { %1882 = vmatprep.subr.bf16.mxu0 %v2499_v37  ;;  %v2585_v37 = vld [vmem:[%s3521_s1 + $0x730] ss:$8 sps:$4 sm:$0xff]  }
  0x97   :  { %1719 = vmatpush1.bf16.msra.mxu1 %v2494_v38  ;;  %v2590_v38 = vld [vmem:[%s3521_s1 + $0x344] ss:$8 sps:$4 sm:$0xff]  }
  0x98   :  { %1883 = vmatpush1.bf16.msra.mxu0 %v2497_v39  ;;  %1720 = vmatprep.subr.bf16.mxu1 %v2502_v40  ;;  %v2593_v39 = vld [vmem:[%s3521_s1 + $0x744] ss:$8 sps:$4 sm:$0xff]   ;;  %v2588_v40 = vld [vmem:[%s3521_s1 + $0x340] ss:$8 sps:$4 sm:$0xff]  }
  0x99   :  { %1884 = vmatprep.subr.bf16.mxu0 %v2505_v41  ;;  %v2591_v41 = vld [vmem:[%s3521_s1 + $0x740] ss:$8 sps:$4 sm:$0xff]  }
  0x9b   :  { %1721 = vmatpush1.bf16.msra.mxu1 %v2500_v42  ;;  %v2596_v42 = vld [vmem:[%s3521_s1 + $0x354] ss:$8 sps:$4 sm:$0xff]  }
  0x9c   :  { %1885 = vmatpush1.bf16.msra.mxu0 %v2503_v43  ;;  %1722 = vmatprep.subr.bf16.mxu1 %v2508_v44  ;;  %v2599_v43 = vld [vmem:[%s3521_s1 + $0x754] ss:$8 sps:$4 sm:$0xff]   ;;  %v2594_v44 = vld [vmem:[%s3521_s1 + $0x350] ss:$8 sps:$4 sm:$0xff]  }
  0x9d   :  { %1886 = vmatprep.subr.bf16.mxu0 %v2511_v45  ;;  %v2597_v45 = vld [vmem:[%s3521_s1 + $0x750] ss:$8 sps:$4 sm:$0xff]  }
  0x9f   :  { %1723 = vmatpush1.bf16.msra.mxu1 %v2506_v46  ;;  %v2602_v46 = vld [vmem:[%s3521_s1 + $0x364] ss:$8 sps:$4 sm:$0xff]  }
  0xa0   :  { %1887 = vmatpush1.bf16.msra.mxu0 %v2509_v47  ;;  %1724 = vmatprep.subr.bf16.mxu1 %v2514_v48  ;;  %v2605_v47 = vld [vmem:[%s3521_s1 + $0x764] ss:$8 sps:$4 sm:$0xff]   ;;  %v2600_v48 = vld [vmem:[%s3521_s1 + $0x360] ss:$8 sps:$4 sm:$0xff]  }
  0xa1   :  { %1888 = vmatprep.subr.bf16.mxu0 %v2517_v49  ;;  %v2603_v49 = vld [vmem:[%s3521_s1 + $0x760] ss:$8 sps:$4 sm:$0xff]  }
  0xa3   :  { %1725 = vmatpush1.bf16.msra.mxu1 %v2512_v50  ;;  %v2608_v50 = vld [vmem:[%s3521_s1 + $0x374] ss:$8 sps:$4 sm:$0xff]  }
  0xa4   :  { %1889 = vmatpush1.bf16.msra.mxu0 %v2515_v51  ;;  %1726 = vmatprep.subr.bf16.mxu1 %v2520_v52  ;;  %v2611_v51 = vld [vmem:[%s3521_s1 + $0x774] ss:$8 sps:$4 sm:$0xff]   ;;  %v2606_v52 = vld [vmem:[%s3521_s1 + $0x370] ss:$8 sps:$4 sm:$0xff]  }
  0xa5   :  { %1890 = vmatprep.subr.bf16.mxu0 %v2523_v53  ;;  %v2609_v53 = vld [vmem:[%s3521_s1 + $0x770] ss:$8 sps:$4 sm:$0xff]  }
  0xa7   :  { %1727 = vmatpush1.bf16.msra.mxu1 %v2518_v54  ;;  %v2614_v54 = vld [vmem:[%s3521_s1 + $0x384] ss:$8 sps:$4 sm:$0xff]  }
  0xa8   :  { %1891 = vmatpush1.bf16.msra.mxu0 %v2521_v55  ;;  %1728 = vmatprep.subr.bf16.mxu1 %v2526_v56  ;;  %v2617_v55 = vld [vmem:[%s3521_s1 + $0x784] ss:$8 sps:$4 sm:$0xff]   ;;  %v2612_v56 = vld [vmem:[%s3521_s1 + $0x380] ss:$8 sps:$4 sm:$0xff]  }
  0xa9   :  { %1892 = vmatprep.subr.bf16.mxu0 %v2529_v57  ;;  %v2615_v57 = vld [vmem:[%s3521_s1 + $0x780] ss:$8 sps:$4 sm:$0xff]  }
  0xab   :  { %1729 = vmatpush1.bf16.msra.mxu1 %v2524_v58  ;;  %v2620_v58 = vld [vmem:[%s3521_s1 + $0x394] ss:$8 sps:$4 sm:$0xff]  }
  0xac   :  { %1893 = vmatpush1.bf16.msra.mxu0 %v2527_v59  ;;  %1730 = vmatprep.subr.bf16.mxu1 %v2532_v60  ;;  %v2623_v59 = vld [vmem:[%s3521_s1 + $0x794] ss:$8 sps:$4 sm:$0xff]   ;;  %v2618_v60 = vld [vmem:[%s3521_s1 + $0x390] ss:$8 sps:$4 sm:$0xff]  }
  0xad   :  { %1894 = vmatprep.subr.bf16.mxu0 %v2535_v61  ;;  %v2621_v61 = vld [vmem:[%s3521_s1 + $0x790] ss:$8 sps:$4 sm:$0xff]  }
  0xaf   :  { %1731 = vmatpush1.bf16.msra.mxu1 %v2530_v62  ;;  %v2626_v62 = vld [vmem:[%s3521_s1 + $0x3a4] ss:$8 sps:$4 sm:$0xff]  }
  0xb0   :  { %1895 = vmatpush1.bf16.msra.mxu0 %v2533_v63  ;;  %1732 = vmatprep.subr.bf16.mxu1 %v2538_v0  ;;  %v2629_v63 = vld [vmem:[%s3521_s1 + $0x7a4] ss:$8 sps:$4 sm:$0xff]   ;;  %v2624_v0 = vld [vmem:[%s3521_s1 + $0x3a0] ss:$8 sps:$4 sm:$0xff]  }
  0xb1   :  { %1896 = vmatprep.subr.bf16.mxu0 %v2541_v1  ;;  %v2627_v1 = vld [vmem:[%s3521_s1 + $0x7a0] ss:$8 sps:$4 sm:$0xff]  }
  0xb3   :  { %1733 = vmatpush1.bf16.msra.mxu1 %v2536_v2  ;;  %v2632_v2 = vld [vmem:[%s3521_s1 + $0x3b4] ss:$8 sps:$4 sm:$0xff]  }
  0xb4   :  { %1897 = vmatpush1.bf16.msra.mxu0 %v2539_v3  ;;  %1734 = vmatprep.subr.bf16.mxu1 %v2544_v4  ;;  %v2635_v3 = vld [vmem:[%s3521_s1 + $0x7b4] ss:$8 sps:$4 sm:$0xff]   ;;  %v2630_v4 = vld [vmem:[%s3521_s1 + $0x3b0] ss:$8 sps:$4 sm:$0xff]  }
  0xb5   :  { %1898 = vmatprep.subr.bf16.mxu0 %v2547_v5  ;;  %v2633_v5 = vld [vmem:[%s3521_s1 + $0x7b0] ss:$8 sps:$4 sm:$0xff]  }
  0xb7   :  { %1735 = vmatpush1.bf16.msra.mxu1 %v2542_v6  ;;  %v2638_v6 = vld [vmem:[%s3521_s1 + $0x3c4] ss:$8 sps:$4 sm:$0xff]  }
  0xb8   :  { %1899 = vmatpush1.bf16.msra.mxu0 %v2545_v7  ;;  %1736 = vmatprep.subr.bf16.mxu1 %v2550_v8  ;;  %v2641_v7 = vld [vmem:[%s3521_s1 + $0x7c4] ss:$8 sps:$4 sm:$0xff]   ;;  %v2636_v8 = vld [vmem:[%s3521_s1 + $0x3c0] ss:$8 sps:$4 sm:$0xff]  }
  0xb9   :  { %1900 = vmatprep.subr.bf16.mxu0 %v2553_v9  ;;  %v2639_v9 = vld [vmem:[%s3521_s1 + $0x7c0] ss:$8 sps:$4 sm:$0xff]  }
  0xbb   :  { %1737 = vmatpush1.bf16.msra.mxu1 %v2548_v10  ;;  %v2644_v10 = vld [vmem:[%s3521_s1 + $0x3d4] ss:$8 sps:$4 sm:$0xff]  }
  0xbc   :  { %1901 = vmatpush1.bf16.msra.mxu0 %v2551_v11  ;;  %1738 = vmatprep.subr.bf16.mxu1 %v2556_v12  ;;  %v2647_v11 = vld [vmem:[%s3521_s1 + $0x7d4] ss:$8 sps:$4 sm:$0xff]   ;;  %v2642_v12 = vld [vmem:[%s3521_s1 + $0x3d0] ss:$8 sps:$4 sm:$0xff]  }
  0xbd   :  { %1902 = vmatprep.subr.bf16.mxu0 %v2559_v13  ;;  %v2645_v13 = vld [vmem:[%s3521_s1 + $0x7d0] ss:$8 sps:$4 sm:$0xff]  }
  0xbf   :  { %1739 = vmatpush1.bf16.msra.mxu1 %v2554_v14  ;;  %v2650_v14 = vld [vmem:[%s3521_s1 + $0x3e4] ss:$8 sps:$4 sm:$0xff]  }
  0xc0   :  { %1903 = vmatpush1.bf16.msra.mxu0 %v2557_v15  ;;  %1749 = vmatprep.subr.bf16.mxu1 %v2564_v16  ;;  %v2653_v15 = vld [vmem:[%s3521_s1 + $0x7e4] ss:$8 sps:$4 sm:$0xff]   ;;  %v2648_v16 = vld [vmem:[%s3521_s1 + $0x3e0] ss:$8 sps:$4 sm:$0xff]  }
  0xc1   :  { %1913 = vmatprep.subr.bf16.mxu0 %v2569_v17  ;;  %v2651_v17 = vld [vmem:[%s3521_s1 + $0x7e0] ss:$8 sps:$4 sm:$0xff]  }
  0xc2   :  { %1741 = vmatmul.mubr.bf16.vlgmr.msra.gmra.mrb[0].mxu1 %v1968_v19  ;;  %v2656_v19 = vld [vmem:[%s3521_s1 + $0x3f4] ss:$8 sps:$4 sm:$0xff]  }
  0xc3   :  { %1905 = vmatmul.mubr.bf16.vlgmr.msra.gmra.mrb[0].mxu0 %v1976_v21  ;;  %1750 = vmatpush1.bf16.msra.mxu1 %v2562_v24  ;;  %v2659_v21 = vld [vmem:[%s3521_s1 + $0x7f4] ss:$8 sps:$4 sm:$0xff]   ;;  %v2654_v24 = vld [vmem:[%s3521_s1 + $0x3f0] ss:$8 sps:$4 sm:$0xff]  }
  0xc4   :  { %1914 = vmatpush1.bf16.msra.mxu0 %v2567_v18  ;;  %1751 = vmatprep.subr.bf16.mxu1 %v2572_v20  ;;  %v2657_v18 = vld [vmem:[%s3521_s1 + $0x7f0] ss:$8 sps:$4 sm:$0xff]   ;;  %v1970_v20 = vcombine.low %v3311_v22, %v3311_v22 }
  0xc5   :  { %1915 = vmatprep.subr.bf16.mxu0 %v2575_v25  ;;  %1781 = vmatprep.mubr.bf16.mxu1 %v1971_v26  ;;  %v1978_v25 = vcombine.low %v3316_v23, %v3316_v23  ;;  %v280_v26 = vlaneseq }
  0xc6   :  { %1945 = vmatprep.mubr.bf16.mxu0 %v1979_v27 }
  0xc7   :  { %1752 = vmatpush1.bf16.msra.mxu1 %v2570_v28  ;;  %v281_v27 = vshrl.u32 %v280_v26, 7 }
  0xc8   :  { %1916 = vmatpush1.bf16.msra.mxu0 %v2573_v29  ;;  %1753 = vmatprep.subr.bf16.mxu1 %v2578_v30  ;;  %v278_v29 = vld [vmem:[%s3523_s2] sm:$0x3] }
  0xc9   :  { %1917 = vmatprep.subr.bf16.mxu0 %v2581_v31  ;;  %v282_v28 = vsub.s32 0, %v281_v27  ;;  %v286_v30 = vsub.s32 1, %v281_v27 }
  0xcb   :  { %1754 = vmatpush1.bf16.msra.mxu1 %v2576_v32  ;;  %v283_v31 = vrot.slane %v278_v29, %v282_v28  ;;  %v287_v32 = vrot.slane %v278_v29, %v286_v30 }
  0xcc   :  { %1918 = vmatpush1.bf16.msra.mxu0 %v2579_v33  ;;  %1755 = vmatprep.subr.bf16.mxu1 %v2584_v34 }
  0xcd   :  { %1919 = vmatprep.subr.bf16.mxu0 %v2587_v35 }
  0xcf   :  { %1756 = vmatpush1.bf16.msra.mxu1 %v2582_v36 }
  0xd0   :  { %1920 = vmatpush1.bf16.msra.mxu0 %v2585_v37  ;;  %1757 = vmatprep.subr.bf16.mxu1 %v2590_v38 }
  0xd1   :  { %1921 = vmatprep.subr.bf16.mxu0 %v2593_v39 }
  0xd3   :  { %1758 = vmatpush1.bf16.msra.mxu1 %v2588_v40 }
  0xd4   :  { %1922 = vmatpush1.bf16.msra.mxu0 %v2591_v41  ;;  %1759 = vmatprep.subr.bf16.mxu1 %v2596_v42 }
  0xd5   :  { %1923 = vmatprep.subr.bf16.mxu0 %v2599_v43 }
  0xd7   :  { %1760 = vmatpush1.bf16.msra.mxu1 %v2594_v44 }
  0xd8   :  { %1924 = vmatpush1.bf16.msra.mxu0 %v2597_v45  ;;  %1761 = vmatprep.subr.bf16.mxu1 %v2602_v46 }
  0xd9   :  { %1925 = vmatprep.subr.bf16.mxu0 %v2605_v47 }
  0xdb   :  { %1762 = vmatpush1.bf16.msra.mxu1 %v2600_v48 }
  0xdc   :  { %1926 = vmatpush1.bf16.msra.mxu0 %v2603_v49  ;;  %1763 = vmatprep.subr.bf16.mxu1 %v2608_v50 }
  0xdd   :  { %1927 = vmatprep.subr.bf16.mxu0 %v2611_v51 }
  0xdf   :  { %1764 = vmatpush1.bf16.msra.mxu1 %v2606_v52 }
  0xe0   :  { %1928 = vmatpush1.bf16.msra.mxu0 %v2609_v53  ;;  %1765 = vmatprep.subr.bf16.mxu1 %v2614_v54 }
  0xe1   :  { %1929 = vmatprep.subr.bf16.mxu0 %v2617_v55 }
  0xe3   :  { %1766 = vmatpush1.bf16.msra.mxu1 %v2612_v56 }
  0xe4   :  { %1930 = vmatpush1.bf16.msra.mxu0 %v2615_v57  ;;  %1767 = vmatprep.subr.bf16.mxu1 %v2620_v58 }
  0xe5   :  { %1931 = vmatprep.subr.bf16.mxu0 %v2623_v59 }
  0xe7   :  { %1768 = vmatpush1.bf16.msra.mxu1 %v2618_v60 }
  0xe8   :  { %1932 = vmatpush1.bf16.msra.mxu0 %v2621_v61  ;;  %1769 = vmatprep.subr.bf16.mxu1 %v2626_v62 }
  0xe9   :  { %1933 = vmatprep.subr.bf16.mxu0 %v2629_v63 }
  0xeb   :  { %1770 = vmatpush1.bf16.msra.mxu1 %v2624_v0 }
  0xec   :  { %1934 = vmatpush1.bf16.msra.mxu0 %v2627_v1  ;;  %1771 = vmatprep.subr.bf16.mxu1 %v2632_v2 }
  0xed   :  { %1935 = vmatprep.subr.bf16.mxu0 %v2635_v3 }
  0xef   :  { %1772 = vmatpush1.bf16.msra.mxu1 %v2630_v4 }
  0xf0   :  { %1936 = vmatpush1.bf16.msra.mxu0 %v2633_v5  ;;  %1773 = vmatprep.subr.bf16.mxu1 %v2638_v6 }
  0xf1   :  { %1937 = vmatprep.subr.bf16.mxu0 %v2641_v7 }
  0xf3   :  { %1774 = vmatpush1.bf16.msra.mxu1 %v2636_v8 }
  0xf4   :  { %1938 = vmatpush1.bf16.msra.mxu0 %v2639_v9  ;;  %1775 = vmatprep.subr.bf16.mxu1 %v2644_v10 }
  0xf5   :  { %1939 = vmatprep.subr.bf16.mxu0 %v2647_v11 }
  0xf7   :  { %1776 = vmatpush1.bf16.msra.mxu1 %v2642_v12 }
  0xf8   :  { %1940 = vmatpush1.bf16.msra.mxu0 %v2645_v13  ;;  %1777 = vmatprep.subr.bf16.mxu1 %v2650_v14 }
  0xf9   :  { %1941 = vmatprep.subr.bf16.mxu0 %v2653_v15 }
  0xfb   :  { %1778 = vmatpush1.bf16.msra.mxu1 %v2648_v16 }
  0xfc   :  { %1942 = vmatpush1.bf16.msra.mxu0 %v2651_v17  ;;  %1779 = vmatprep.subr.bf16.mxu1 %v2656_v19 }
  0xfd   :  { %1943 = vmatprep.subr.bf16.mxu0 %v2659_v21 }
  0xff   :  { %1780 = vmatpush1.bf16.msra.mxu1 %v2654_v24 }
 0x100   :  { %1944 = vmatpush1.bf16.msra.mxu0 %v2657_v18 }
 0x102   :  { %1782 = vmatmul.mubr.bf16.vlgmr.msra.gmra.mrb[0].mxu1 %v1970_v20 }
 0x103   :  { %1946 = vmatmul.mubr.bf16.vlgmr.msra.gmra.mrb[0].mxu0 %v1978_v25 }
 0x1d5   :  { %v1783_v33 = vpop.f32.mrb[0].mxu1 }
 0x1d6   :  { %v1947_v34 = vpop.f32.mrb[0].mxu0  ;;  %v2236_v22 = vadd.f32 %v1783_v33, %v283_v31  ;;  %v1785_v35 = vpop.f32.mrb[1].mxu1 }
 0x1d7   :  { %v1949_v36 = vpop.f32.mrb[1].mxu0  ;;  %v2238_v23 = vadd.f32 %v1785_v35, %v287_v32  ;;  %v1787_v37 = vpop.f32.mrb[2].mxu1 }
 0x1d8   :  { %v1951_v38 = vpop.f32.mrb[2].mxu0  ;;  %v2237_v39 = vadd.f32 %v2236_v22, %v1947_v34  ;;  %v1788_v40 = vpop.f32.mrb[3].mxu1 }
 0x1d9   :  { %v1952_v41 = vpop.f32.mrb[3].mxu0  ;;  %v2239_v42 = vadd.f32 %v2238_v23, %v1949_v36 }
 0x1da   :  { %v1954_v43 = vmul.f32 0.1, %v2237_v39 }
 0x1db   :  { %v1955_v44 = vmul.f32 0.1, %v2239_v42 }
 0x1dc   :  { %v1956_v45 = vmax.f32 %v2237_v39, %v1954_v43 }
 0x1dd   :  { %v1957_v46 = vmax.f32 %v2239_v42, %v1955_v44 }
 0x1de   :  { %1958 = vst [vmem:[%s3524_s3] sm:$0xff] %v1956_v45 }
 0x1df   :  { %1959 = vst [vmem:[%s3524_s3 + $0x8] sm:$0xff] %v1957_v46 }

</bundles_post_ra>
